<compile_context>
chip_gen: v5e
topology: v5e:2x2
jax: 0.10.0
libtpu: 0.0.40
codegen_flags: <defaults>
</compile_context>

<pallas_src>
import math

import jax
import jax.numpy as jnp
from jax import lax
from jax.experimental import pallas as pl
from jax.experimental.pallas import tpu as pltpu

# ----- small synthetic config -----
B = 2            # batch
S = 8            # sequence length
H = 32           # hidden size
NUM_HEADS = 2
HEAD_DIM = H // NUM_HEADS
INTER = 64       # intermediate size
NUM_LAYERS = 2
LN_EPS = 1e-12
DTYPE = jnp.float32          # hidden-state / output dtype
WDTYPE = jnp.bfloat16        # matmul-operand (weight) dtype

_ATT_SCALE = 1.0 / math.sqrt(HEAD_DIM)
_GELU_C = math.sqrt(2.0 / math.pi)
_NEG_BIG = -1e9              # cross-batch block mask (exp underflows to 0)


def _gelu_new(x):
    # HF "gelu_new" (tanh approximation), f32
    return 0.5 * x * (1.0 + jnp.tanh(_GELU_C * (x + 0.044715 * x * x * x)))


def _layer_norm(x, gamma, beta):
    mean = jnp.mean(x, axis=-1, keepdims=True)
    var = jnp.mean(jnp.square(x - mean), axis=-1, keepdims=True)
    return (x - mean) * lax.rsqrt(var + LN_EPS) * gamma + beta


# --------------- Pallas kernel: ONE BERT layer per grid step ------------------
def encoder_kernel(hs_ref, mask_ref,
                   wq_ref, wk_ref, wv_ref, bq_ref, bk_ref, bv_ref,
                   wo_ref, bo_ref, g1_ref, be1_ref,
                   wi_ref, bi_ref, w2_ref, b2_ref, g2_ref, be2_ref,
                   out_ref, ctx_ref):
    l = pl.program_id(0)

    # Seed the resident hidden state (the output block is revisited every layer
    # -> stays in VMEM across the whole encoder, written to HBM once at the end).
    @pl.when(l == 0)
    def _():
        out_ref[...] = hs_ref[...]

    x = out_ref[...].astype(jnp.float32)        # (B*S, H) running hidden state
    x_bf = x.astype(WDTYPE)                     # bf16 matmul operand
    mask = mask_ref[...]                        # (B*S, B*S) additive, f32

    # ---- self-attention: Q/K/V projections (bf16 MXU, f32 accumulate) ----
    q = jnp.dot(x_bf, wq_ref[0], preferred_element_type=jnp.float32) + bq_ref[0]
    k = jnp.dot(x_bf, wk_ref[0], preferred_element_type=jnp.float32) + bk_ref[0]
    v = jnp.dot(x_bf, wv_ref[0], preferred_element_type=jnp.float32) + bv_ref[0]

    # per-head batched attention over ALL B*S rows; padding + block-diagonal
    # cross-batch masking is fused into `mask`, so no per-batch loop / concat.
    for h in range(NUM_HEADS):                  # tiny static loop, no concats
        cols = slice(h * HEAD_DIM, (h + 1) * HEAD_DIM)
        qh = q[:, cols].astype(WDTYPE)
        kh = k[:, cols].astype(WDTYPE)
        vh = v[:, cols].astype(WDTYPE)
        s = jnp.dot(qh, kh.T, preferred_element_type=jnp.float32)
        s = s * _ATT_SCALE + mask               # (B*S, B*S)
        s = s - jnp.max(s, axis=-1, keepdims=True)
        e = jnp.exp(s)
        denom = jnp.sum(e, axis=-1, keepdims=True)
        p = e * pl.reciprocal(denom, approx=True)      # EUP slot, not VALU div
        ctx_ref[:, cols] = jnp.dot(p.astype(WDTYPE), vh,
                                   preferred_element_type=jnp.float32)

    ctx = ctx_ref[...]                          # (B*S, H), f32

    # attention output projection + residual + LayerNorm (f32)
    attn = (jnp.dot(ctx.astype(WDTYPE), wo_ref[0],
                    preferred_element_type=jnp.float32) + bo_ref[0])
    attn = _layer_norm(attn + x, g1_ref[0], be1_ref[0])

    # intermediate dense + GELU
    inter = _gelu_new(
        jnp.dot(attn.astype(WDTYPE), wi_ref[0],
                preferred_element_type=jnp.float32) + bi_ref[0])

    # output dense + residual + LayerNorm
    out = (jnp.dot(inter.astype(WDTYPE), w2_ref[0],
                   preferred_element_type=jnp.float32) + b2_ref[0])
    out = _layer_norm(out + attn, g2_ref[0], be2_ref[0])

    out_ref[...] = out.astype(out_ref.dtype)    # resident; HBM writeback at end


# ---------------- BlockSpec helpers -------------------------------------------
def _rep_spec(shape):
    """Whole array, same block every layer step."""
    n = len(shape)
    return pl.BlockSpec(shape, lambda l, _n=n: (0,) * _n)


def _layer_spec(shape):
    """One layer's slice of a (NUM_LAYERS, *shape) stacked parameter."""
    n = len(shape)
    return pl.BlockSpec((1,) + shape, lambda l, _n=n: (l,) + (0,) * _n)


def bert_encoder(hidden, attention_mask, params):
    """CustomBertEncoder.forward (kfms=None, head_mask entries None)."""
    # combined additive attention mask, built ONCE:
    #   same batch & valid key -> 0, same batch & padded key -> -10000,
    #   different batch (rows folded together) -> -1e9 (exp -> exactly 0)
    ext = (1.0 - attention_mask.astype(jnp.float32)) * -10000.0     # (B, S)
    key_pad = ext.reshape(1, B * S)                                 # per-key
    batch_ids = jnp.arange(B * S) // S
    same = (batch_ids[:, None] == batch_ids[None, :]).astype(jnp.float32)
    full_mask = same * key_pad + (1.0 - same) * _NEG_BIG            # (B*S, B*S)

    x2d = hidden.reshape(B * S, H)                                  # row slab

    in_specs = [
        _rep_spec((B * S, H)),            # hidden rows (read only at layer 0)
        _rep_spec((B * S, B * S)),        # combined additive mask
        _layer_spec((H, H)),              # Wq
        _layer_spec((H, H)),              # Wk
        _layer_spec((H, H)),              # Wv
        _layer_spec((1, H)),              # bq
        _layer_spec((1, H)),              # bk
        _layer_spec((1, H)),              # bv
        _layer_spec((H, H)),              # attn out W
        _layer_spec((1, H)),              # attn out b
        _layer_spec((1, H)),              # LN1 gamma
        _layer_spec((1, H)),              # LN1 beta
        _layer_spec((H, INTER)),          # intermediate W
        _layer_spec((1, INTER)),          # intermediate b
        _layer_spec((INTER, H)),          # output W
        _layer_spec((1, H)),              # output b
        _layer_spec((1, H)),              # LN2 gamma
        _layer_spec((1, H)),              # LN2 beta
    ]

    out = pl.pallas_call(
        encoder_kernel,
        out_shape=jax.ShapeDtypeStruct((B * S, H), DTYPE),
        grid_spec=pltpu.PrefetchScalarGridSpec(
            num_scalar_prefetch=0,
            grid=(NUM_LAYERS,),                 # layer axis on the grid ->
            in_specs=in_specs,                  # per-layer weight double-buffering
            out_specs=pl.BlockSpec((B * S, H), lambda l: (0, 0)),  # resident
            scratch_shapes=[pltpu.VMEM((B * S, H), jnp.float32)],  # head-ctx slab
        ),
        compiler_params=pltpu.CompilerParams(
            dimension_semantics=("arbitrary",)),
    )(x2d, full_mask,
      params["wq"], params["wk"], params["wv"],
      params["bq"], params["bk"], params["bv"],
      params["wo"], params["bo"], params["g1"], params["be1"],
      params["wi"], params["bi"], params["w2"], params["b2"],
      params["g2"], params["be2"])
    return out.reshape(B, S, H)


# ---------------- pure-JAX reference (mirrors the kernel's mixed precision) ----
def _q(x):
    # simulate bf16 matmul-operand rounding with f32 accumulation
    return x.astype(jnp.bfloat16).astype(jnp.float32)


def _ref_encoder(hidden, attention_mask, params):
    ext = (1.0 - attention_mask.astype(jnp.float32)) * -10000.0     # (B, S)
    x = hidden
    for l in range(NUM_LAYERS):
        xb = _q(x)
        wq = params["wq"][l].astype(jnp.float32)
        wk = params["wk"][l].astype(jnp.float32)
        wv = params["wv"][l].astype(jnp.float32)
        q = xb @ wq + params["bq"][l][0]
        k = xb @ wk + params["bk"][l][0]
        v = xb @ wv + params["bv"][l][0]

        def split(t):
            return t.reshape(B, S, NUM_HEADS, HEAD_DIM).transpose(0, 2, 1, 3)

        qh, kh, vh = split(q), split(k), split(v)
        scores = jnp.einsum("bhqd,bhkd->bhqk", _q(qh), _q(kh)) * _ATT_SCALE
        scores = scores + ext[:, None, None, :]
        probs = jax.nn.softmax(scores, axis=-1)
        ctx = jnp.einsum("bhqk,bhkd->bhqd", _q(probs), _q(vh))
        ctx = ctx.transpose(0, 2, 1, 3).reshape(B, S, H)

        attn = _q(ctx) @ params["wo"][l].astype(jnp.float32) + params["bo"][l][0]
        attn = _layer_norm(attn + x, params["g1"][l][0], params["be1"][l][0])
        inter = _gelu_new(_q(attn) @ params["wi"][l].astype(jnp.float32)
                          + params["bi"][l][0])
        out = _q(inter) @ params["w2"][l].astype(jnp.float32) + params["b2"][l][0]
        x = _layer_norm(out + attn, params["g2"][l][0], params["be2"][l][0])
    return x


# ---------------- deterministic parameter construction ------------------------
def make_params(key):
    w_init = lambda k, shp: (0.02 * jax.random.normal(k, shp)).astype(WDTYPE)
    b_init = lambda k, shp: (0.02 * jax.random.normal(k, shp)).astype(DTYPE)
    zeros = lambda shp: jnp.zeros(shp, DTYPE)
    ones = lambda shp: jnp.ones(shp, DTYPE)

    layer_keys = jax.random.split(key, NUM_LAYERS)
    acc = {n: [] for n in ("wq", "wk", "wv", "bq", "bk", "bv",
                           "wo", "bo", "wi", "bi", "w2", "b2")}
    for lk in layer_keys:
        ks = jax.random.split(lk, 12)
        acc["wq"].append(w_init(ks[0], (H, H)))
        acc["wk"].append(w_init(ks[1], (H, H)))
        acc["wv"].append(w_init(ks[2], (H, H)))
        acc["bq"].append(b_init(ks[3], (1, H)))
        acc["bk"].append(b_init(ks[4], (1, H)))
        acc["bv"].append(b_init(ks[5], (1, H)))
        acc["wo"].append(w_init(ks[6], (H, H)))
        acc["bo"].append(b_init(ks[7], (1, H)))
        acc["wi"].append(w_init(ks[8], (H, INTER)))
        acc["bi"].append(b_init(ks[9], (1, INTER)))
        acc["w2"].append(w_init(ks[10], (INTER, H)))
        acc["b2"].append(b_init(ks[11], (1, H)))

    params = {n: jnp.stack(v) for n, v in acc.items()}
    L = NUM_LAYERS
    params.update(g1=ones((L, 1, H)), be1=zeros((L, 1, H)),
                  g2=ones((L, 1, H)), be2=zeros((L, 1, H)))
    return params


if __name__ == "__main__":
    root = jax.random.PRNGKey(0)
    k_hidden, k_params = jax.random.split(root)

    hidden_states = jax.random.normal(k_hidden, (B, S, H), dtype=DTYPE)
    attention_mask = jnp.ones((B, S), dtype=DTYPE).at[1, -2:].set(0.0)  # pad 2 tokens

    params = make_params(k_params)

    out = jax.block_until_ready(bert_encoder(hidden_states, attention_mask, params))
    ref = jax.block_until_ready(_ref_encoder(hidden_states, attention_mask, params))

    assert out.shape == (B, S, H)
    # tolerance covers the approximate EUP reciprocal in the softmax and
    # MXU-vs-XLA accumulation-order differences of the bf16/f32 mixed matmuls
    assert jnp.allclose(out, ref, atol=1e-2, rtol=1e-2), "mismatch vs pure-JAX reference"

    print("KERNEL_OK")
</pallas_src>

<mosaic_0001>
module attributes {stable_mosaic.version = 11 : i64} {
  func.func @encoder_kernel(%arg0: i32, %arg1: memref<16x32xf32, #tpu.memory_space<vmem>>, %arg2: memref<16x16xf32, #tpu.memory_space<vmem>>, %arg3: memref<1x32x32xbf16, #tpu.memory_space<vmem>>, %arg4: memref<1x32x32xbf16, #tpu.memory_space<vmem>>, %arg5: memref<1x32x32xbf16, #tpu.memory_space<vmem>>, %arg6: memref<1x1x32xf32, #tpu.memory_space<vmem>>, %arg7: memref<1x1x32xf32, #tpu.memory_space<vmem>>, %arg8: memref<1x1x32xf32, #tpu.memory_space<vmem>>, %arg9: memref<1x32x32xbf16, #tpu.memory_space<vmem>>, %arg10: memref<1x1x32xf32, #tpu.memory_space<vmem>>, %arg11: memref<1x1x32xf32, #tpu.memory_space<vmem>>, %arg12: memref<1x1x32xf32, #tpu.memory_space<vmem>>, %arg13: memref<1x32x64xbf16, #tpu.memory_space<vmem>>, %arg14: memref<1x1x64xf32, #tpu.memory_space<vmem>>, %arg15: memref<1x64x32xbf16, #tpu.memory_space<vmem>>, %arg16: memref<1x1x32xf32, #tpu.memory_space<vmem>>, %arg17: memref<1x1x32xf32, #tpu.memory_space<vmem>>, %arg18: memref<1x1x32xf32, #tpu.memory_space<vmem>>, %arg19: memref<16x32xf32, #tpu.memory_space<vmem>>, %arg20: memref<16x32xf32, #tpu.memory_space<vmem>>) attributes {dimension_semantics = [#tpu.dimension_semantics<arbitrary>], iteration_bounds = array<i64: 2>, scalar_prefetch = 0 : i64, scratch_operands = 1 : i64, tpu.core_type = #tpu.core_type<tc>, window_params = [{pipeline_mode = #tpu.pipeline_mode<synchronous>, transform_indices = @transform_0, window_bounds = array<i64: 16, 32>}, {pipeline_mode = #tpu.pipeline_mode<synchronous>, transform_indices = @transform_1, window_bounds = array<i64: 16, 16>}, {transform_indices = @transform_2, window_bounds = array<i64: 1, 32, 32>}, {transform_indices = @transform_3, window_bounds = array<i64: 1, 32, 32>}, {transform_indices = @transform_4, window_bounds = array<i64: 1, 32, 32>}, {transform_indices = @transform_5, window_bounds = array<i64: 1, 1, 32>}, {transform_indices = @transform_6, window_bounds = array<i64: 1, 1, 32>}, {transform_indices = @transform_7, window_bounds = array<i64: 1, 1, 32>}, {transform_indices = @transform_8, window_bounds = array<i64: 1, 32, 32>}, {transform_indices = @transform_9, window_bounds = array<i64: 1, 1, 32>}, {transform_indices = @transform_10, window_bounds = array<i64: 1, 1, 32>}, {transform_indices = @transform_11, window_bounds = array<i64: 1, 1, 32>}, {transform_indices = @transform_12, window_bounds = array<i64: 1, 32, 64>}, {transform_indices = @transform_13, window_bounds = array<i64: 1, 1, 64>}, {transform_indices = @transform_14, window_bounds = array<i64: 1, 64, 32>}, {transform_indices = @transform_15, window_bounds = array<i64: 1, 1, 32>}, {transform_indices = @transform_16, window_bounds = array<i64: 1, 1, 32>}, {transform_indices = @transform_17, window_bounds = array<i64: 1, 1, 32>}, {pipeline_mode = #tpu.pipeline_mode<synchronous>, transform_indices = @transform_18, window_bounds = array<i64: 16, 32>}]} {
    %c0_i32 = arith.constant 0 : i32
    %0 = arith.cmpi eq, %arg0, %c0_i32 : i32
    %1 = arith.extui %0 : i1 to i32
    %c0_i32_0 = arith.constant 0 : i32
    %2 = arith.cmpi ne, %1, %c0_i32_0 : i32
    scf.if %2 {
      %c0_88 = arith.constant 0 : index
      %c0_89 = arith.constant 0 : index
      %168 = vector.load %arg1[%c0_88, %c0_89] : memref<16x32xf32, #tpu.memory_space<vmem>>, vector<16x32xf32>
      %c0_90 = arith.constant 0 : index
      %c0_91 = arith.constant 0 : index
      %169 = vector.load %arg19[%c0_90, %c0_91] : memref<16x32xf32, #tpu.memory_space<vmem>>, vector<16x32xf32>
      tpu.vector_store %arg19[%c0_90, %c0_91], %168 {strides = array<i32>} : memref<16x32xf32, #tpu.memory_space<vmem>>, vector<16x32xf32>,
    } else {
    }
    %c0 = arith.constant 0 : index
    %c0_1 = arith.constant 0 : index
    %3 = vector.load %arg19[%c0, %c0_1] : memref<16x32xf32, #tpu.memory_space<vmem>>, vector<16x32xf32>
    %4 = arith.truncf %3 : vector<16x32xf32> to vector<16x32xbf16>
    %c0_2 = arith.constant 0 : index
    %c0_3 = arith.constant 0 : index
    %5 = vector.load %arg2[%c0_2, %c0_3] : memref<16x16xf32, #tpu.memory_space<vmem>>, vector<16x16xf32>
    %c0_4 = arith.constant 0 : index
    %c0_5 = arith.constant 0 : index
    %c0_6 = arith.constant 0 : index
    %6 = vector.load %arg3[%c0_4, %c0_5, %c0_6] : memref<1x32x32xbf16, #tpu.memory_space<vmem>>, vector<1x32x32xbf16>
    %7 = vector.shape_cast %6 : vector<1x32x32xbf16> to vector<32x32xbf16>
    %cst = arith.constant dense<0.000000e+00> : vector<16x32xf32>
    %8 = tpu.matmul %4, %7, %cst {dimension_numbers = #tpu.dot_dimension_numbers<[1], [0], [0], [1], [0, 0, 1, 1], [], []>} : vector<16x32xbf16>, vector<32x32xbf16>, vector<16x32xf32> -> vector<16x32xf32>
    %c0_7 = arith.constant 0 : index
    %c0_8 = arith.constant 0 : index
    %c0_9 = arith.constant 0 : index
    %9 = vector.load %arg6[%c0_7, %c0_8, %c0_9] : memref<1x1x32xf32, #tpu.memory_space<vmem>>, vector<1x1x32xf32>
    %10 = vector.shape_cast %9 : vector<1x1x32xf32> to vector<1x32xf32>
    %11 = vector.broadcast %10 : vector<1x32xf32> to vector<16x32xf32>
    %12 = arith.addf %8, %11 : vector<16x32xf32>
    %c0_10 = arith.constant 0 : index
    %c0_11 = arith.constant 0 : index
    %c0_12 = arith.constant 0 : index
    %13 = vector.load %arg4[%c0_10, %c0_11, %c0_12] : memref<1x32x32xbf16, #tpu.memory_space<vmem>>, vector<1x32x32xbf16>
    %14 = vector.shape_cast %13 : vector<1x32x32xbf16> to vector<32x32xbf16>
    %cst_13 = arith.constant dense<0.000000e+00> : vector<16x32xf32>
    %15 = tpu.matmul %4, %14, %cst_13 {dimension_numbers = #tpu.dot_dimension_numbers<[1], [0], [0], [1], [0, 0, 1, 1], [], []>} : vector<16x32xbf16>, vector<32x32xbf16>, vector<16x32xf32> -> vector<16x32xf32>
    %c0_14 = arith.constant 0 : index
    %c0_15 = arith.constant 0 : index
    %c0_16 = arith.constant 0 : index
    %16 = vector.load %arg7[%c0_14, %c0_15, %c0_16] : memref<1x1x32xf32, #tpu.memory_space<vmem>>, vector<1x1x32xf32>
    %17 = vector.shape_cast %16 : vector<1x1x32xf32> to vector<1x32xf32>
    %18 = vector.broadcast %17 : vector<1x32xf32> to vector<16x32xf32>
    %19 = arith.addf %15, %18 : vector<16x32xf32>
    %c0_17 = arith.constant 0 : index
    %c0_18 = arith.constant 0 : index
    %c0_19 = arith.constant 0 : index
    %20 = vector.load %arg5[%c0_17, %c0_18, %c0_19] : memref<1x32x32xbf16, #tpu.memory_space<vmem>>, vector<1x32x32xbf16>
    %21 = vector.shape_cast %20 : vector<1x32x32xbf16> to vector<32x32xbf16>
    %cst_20 = arith.constant dense<0.000000e+00> : vector<16x32xf32>
    %22 = tpu.matmul %4, %21, %cst_20 {dimension_numbers = #tpu.dot_dimension_numbers<[1], [0], [0], [1], [0, 0, 1, 1], [], []>} : vector<16x32xbf16>, vector<32x32xbf16>, vector<16x32xf32> -> vector<16x32xf32>
    %c0_21 = arith.constant 0 : index
    %c0_22 = arith.constant 0 : index
    %c0_23 = arith.constant 0 : index
    %23 = vector.load %arg8[%c0_21, %c0_22, %c0_23] : memref<1x1x32xf32, #tpu.memory_space<vmem>>, vector<1x1x32xf32>
    %24 = vector.shape_cast %23 : vector<1x1x32xf32> to vector<1x32xf32>
    %25 = vector.broadcast %24 : vector<1x32xf32> to vector<16x32xf32>
    %26 = arith.addf %22, %25 : vector<16x32xf32>
    %27 = vector.extract_strided_slice %12 {offsets = [0, 0], sizes = [16, 16], strides = [1, 1]} : vector<16x32xf32> to vector<16x16xf32>
    %28 = arith.truncf %27 : vector<16x16xf32> to vector<16x16xbf16>
    %29 = vector.extract_strided_slice %19 {offsets = [0, 0], sizes = [16, 16], strides = [1, 1]} : vector<16x32xf32> to vector<16x16xf32>
    %30 = arith.truncf %29 : vector<16x16xf32> to vector<16x16xbf16>
    %31 = vector.extract_strided_slice %26 {offsets = [0, 0], sizes = [16, 16], strides = [1, 1]} : vector<16x32xf32> to vector<16x16xf32>
    %32 = arith.truncf %31 : vector<16x16xf32> to vector<16x16xbf16>
    %33 = tpu.transpose %30, [1, 0] : vector<16x16xbf16> -> vector<16x16xbf16>
    %cst_24 = arith.constant dense<0.000000e+00> : vector<16x16xf32>
    %34 = tpu.matmul %28, %33, %cst_24 {dimension_numbers = #tpu.dot_dimension_numbers<[1], [0], [0], [1], [0, 0, 1, 1], [], []>} : vector<16x16xbf16>, vector<16x16xbf16>, vector<16x16xf32> -> vector<16x16xf32>
    %cst_25 = arith.constant 2.500000e-01 : f32
    %35 = vector.broadcast %cst_25 : f32 to vector<16x16xf32>
    %36 = arith.mulf %34, %35 : vector<16x16xf32>
    %37 = arith.addf %36, %5 : vector<16x16xf32>
    %cst_26 = arith.constant dense<0xFF800000> : vector<16xf32>
    %38 = vector.multi_reduction <maximumf>, %37, %cst_26 [1] : vector<16x16xf32> to vector<16xf32>
    %39 = vector.shape_cast %38 : vector<16xf32> to vector<16x1xf32>
    %40 = vector.broadcast %39 : vector<16x1xf32> to vector<16x16xf32>
    %41 = arith.subf %37, %40 : vector<16x16xf32>
    %42 = math.exp %41 : vector<16x16xf32>
    %cst_27 = arith.constant dense<0.000000e+00> : vector<16xf32>
    %43 = vector.multi_reduction <add>, %42, %cst_27 [1] : vector<16x16xf32> to vector<16xf32>
    %44 = vector.shape_cast %43 : vector<16xf32> to vector<16x1xf32>
    %45 = tpu.reciprocal %44 {approx = true} : vector<16x1xf32> -> vector<16x1xf32>
    %46 = vector.broadcast %45 : vector<16x1xf32> to vector<16x16xf32>
    %47 = arith.mulf %42, %46 : vector<16x16xf32>
    %48 = arith.truncf %47 : vector<16x16xf32> to vector<16x16xbf16>
    %cst_28 = arith.constant dense<0.000000e+00> : vector<16x16xf32>
    %49 = tpu.matmul %48, %32, %cst_28 {dimension_numbers = #tpu.dot_dimension_numbers<[1], [0], [0], [1], [0, 0, 1, 1], [], []>} : vector<16x16xbf16>, vector<16x16xbf16>, vector<16x16xf32> -> vector<16x16xf32>
    %c0_29 = arith.constant 0 : index
    %c0_30 = arith.constant 0 : index
    %50 = vector.load %arg20[%c0_29, %c0_30] : memref<16x32xf32, #tpu.memory_space<vmem>>, vector<16x16xf32>
    tpu.vector_store %arg20[%c0_29, %c0_30], %49 {strides = array<i32>} : memref<16x32xf32, #tpu.memory_space<vmem>>, vector<16x16xf32>,
    %51 = vector.extract_strided_slice %12 {offsets = [0, 16], sizes = [16, 16], strides = [1, 1]} : vector<16x32xf32> to vector<16x16xf32>
    %52 = arith.truncf %51 : vector<16x16xf32> to vector<16x16xbf16>
    %53 = vector.extract_strided_slice %19 {offsets = [0, 16], sizes = [16, 16], strides = [1, 1]} : vector<16x32xf32> to vector<16x16xf32>
    %54 = arith.truncf %53 : vector<16x16xf32> to vector<16x16xbf16>
    %55 = vector.extract_strided_slice %26 {offsets = [0, 16], sizes = [16, 16], strides = [1, 1]} : vector<16x32xf32> to vector<16x16xf32>
    %56 = arith.truncf %55 : vector<16x16xf32> to vector<16x16xbf16>
    %57 = tpu.transpose %54, [1, 0] : vector<16x16xbf16> -> vector<16x16xbf16>
    %cst_31 = arith.constant dense<0.000000e+00> : vector<16x16xf32>
    %58 = tpu.matmul %52, %57, %cst_31 {dimension_numbers = #tpu.dot_dimension_numbers<[1], [0], [0], [1], [0, 0, 1, 1], [], []>} : vector<16x16xbf16>, vector<16x16xbf16>, vector<16x16xf32> -> vector<16x16xf32>
    %cst_32 = arith.constant 2.500000e-01 : f32
    %59 = vector.broadcast %cst_32 : f32 to vector<16x16xf32>
    %60 = arith.mulf %58, %59 : vector<16x16xf32>
    %61 = arith.addf %60, %5 : vector<16x16xf32>
    %cst_33 = arith.constant dense<0xFF800000> : vector<16xf32>
    %62 = vector.multi_reduction <maximumf>, %61, %cst_33 [1] : vector<16x16xf32> to vector<16xf32>
    %63 = vector.shape_cast %62 : vector<16xf32> to vector<16x1xf32>
    %64 = vector.broadcast %63 : vector<16x1xf32> to vector<16x16xf32>
    %65 = arith.subf %61, %64 : vector<16x16xf32>
    %66 = math.exp %65 : vector<16x16xf32>
    %cst_34 = arith.constant dense<0.000000e+00> : vector<16xf32>
    %67 = vector.multi_reduction <add>, %66, %cst_34 [1] : vector<16x16xf32> to vector<16xf32>
    %68 = vector.shape_cast %67 : vector<16xf32> to vector<16x1xf32>
    %69 = tpu.reciprocal %68 {approx = true} : vector<16x1xf32> -> vector<16x1xf32>
    %70 = vector.broadcast %69 : vector<16x1xf32> to vector<16x16xf32>
    %71 = arith.mulf %66, %70 : vector<16x16xf32>
    %72 = arith.truncf %71 : vector<16x16xf32> to vector<16x16xbf16>
    %cst_35 = arith.constant dense<0.000000e+00> : vector<16x16xf32>
    %73 = tpu.matmul %72, %56, %cst_35 {dimension_numbers = #tpu.dot_dimension_numbers<[1], [0], [0], [1], [0, 0, 1, 1], [], []>} : vector<16x16xbf16>, vector<16x16xbf16>, vector<16x16xf32> -> vector<16x16xf32>
    %c0_36 = arith.constant 0 : index
    %c16 = arith.constant 16 : index
    %74 = vector.load %arg20[%c0_36, %c16] : memref<16x32xf32, #tpu.memory_space<vmem>>, vector<16x16xf32>
    tpu.vector_store %arg20[%c0_36, %c16], %73 {strides = array<i32>} : memref<16x32xf32, #tpu.memory_space<vmem>>, vector<16x16xf32>,
    %c0_37 = arith.constant 0 : index
    %c0_38 = arith.constant 0 : index
    %75 = vector.load %arg20[%c0_37, %c0_38] : memref<16x32xf32, #tpu.memory_space<vmem>>, vector<16x32xf32>
    %76 = arith.truncf %75 : vector<16x32xf32> to vector<16x32xbf16>
    %c0_39 = arith.constant 0 : index
    %c0_40 = arith.constant 0 : index
    %c0_41 = arith.constant 0 : index
    %77 = vector.load %arg9[%c0_39, %c0_40, %c0_41] : memref<1x32x32xbf16, #tpu.memory_space<vmem>>, vector<1x32x32xbf16>
    %78 = vector.shape_cast %77 : vector<1x32x32xbf16> to vector<32x32xbf16>
    %cst_42 = arith.constant dense<0.000000e+00> : vector<16x32xf32>
    %79 = tpu.matmul %76, %78, %cst_42 {dimension_numbers = #tpu.dot_dimension_numbers<[1], [0], [0], [1], [0, 0, 1, 1], [], []>} : vector<16x32xbf16>, vector<32x32xbf16>, vector<16x32xf32> -> vector<16x32xf32>
    %c0_43 = arith.constant 0 : index
    %c0_44 = arith.constant 0 : index
    %c0_45 = arith.constant 0 : index
    %80 = vector.load %arg10[%c0_43, %c0_44, %c0_45] : memref<1x1x32xf32, #tpu.memory_space<vmem>>, vector<1x1x32xf32>
    %81 = vector.shape_cast %80 : vector<1x1x32xf32> to vector<1x32xf32>
    %82 = vector.broadcast %81 : vector<1x32xf32> to vector<16x32xf32>
    %83 = arith.addf %79, %82 : vector<16x32xf32>
    %84 = arith.addf %83, %3 : vector<16x32xf32>
    %c0_46 = arith.constant 0 : index
    %c0_47 = arith.constant 0 : index
    %c0_48 = arith.constant 0 : index
    %85 = vector.load %arg11[%c0_46, %c0_47, %c0_48] : memref<1x1x32xf32, #tpu.memory_space<vmem>>, vector<1x1x32xf32>
    %86 = vector.shape_cast %85 : vector<1x1x32xf32> to vector<1x32xf32>
    %c0_49 = arith.constant 0 : index
    %c0_50 = arith.constant 0 : index
    %c0_51 = arith.constant 0 : index
    %87 = vector.load %arg12[%c0_49, %c0_50, %c0_51] : memref<1x1x32xf32, #tpu.memory_space<vmem>>, vector<1x1x32xf32>
    %88 = vector.shape_cast %87 : vector<1x1x32xf32> to vector<1x32xf32>
    %cst_52 = arith.constant dense<0.000000e+00> : vector<16xf32>
    %89 = vector.multi_reduction <add>, %84, %cst_52 [1] : vector<16x32xf32> to vector<16xf32>
    %90 = vector.shape_cast %89 : vector<16xf32> to vector<16x1xf32>
    %cst_53 = arith.constant 3.200000e+01 : f32
    %91 = vector.broadcast %cst_53 : f32 to vector<16x1xf32>
    %92 = arith.divf %90, %91 : vector<16x1xf32>
    %93 = vector.broadcast %92 : vector<16x1xf32> to vector<16x32xf32>
    %94 = arith.subf %84, %93 : vector<16x32xf32>
    %95 = arith.mulf %94, %94 : vector<16x32xf32>
    %cst_54 = arith.constant dense<0.000000e+00> : vector<16xf32>
    %96 = vector.multi_reduction <add>, %95, %cst_54 [1] : vector<16x32xf32> to vector<16xf32>
    %97 = vector.shape_cast %96 : vector<16xf32> to vector<16x1xf32>
    %cst_55 = arith.constant 3.200000e+01 : f32
    %98 = vector.broadcast %cst_55 : f32 to vector<16x1xf32>
    %99 = arith.divf %97, %98 : vector<16x1xf32>
    %100 = vector.broadcast %92 : vector<16x1xf32> to vector<16x32xf32>
    %101 = arith.subf %84, %100 : vector<16x32xf32>
    %cst_56 = arith.constant 9.99999996E-13 : f32
    %102 = vector.broadcast %cst_56 : f32 to vector<16x1xf32>
    %103 = arith.addf %99, %102 : vector<16x1xf32>
    %104 = math.rsqrt %103 : vector<16x1xf32>
    %105 = vector.broadcast %104 : vector<16x1xf32> to vector<16x32xf32>
    %106 = arith.mulf %101, %105 : vector<16x32xf32>
    %107 = vector.broadcast %86 : vector<1x32xf32> to vector<16x32xf32>
    %108 = arith.mulf %106, %107 : vector<16x32xf32>
    %109 = vector.broadcast %88 : vector<1x32xf32> to vector<16x32xf32>
    %110 = arith.addf %108, %109 : vector<16x32xf32>
    %111 = arith.truncf %110 : vector<16x32xf32> to vector<16x32xbf16>
    %c0_57 = arith.constant 0 : index
    %c0_58 = arith.constant 0 : index
    %c0_59 = arith.constant 0 : index
    %112 = vector.load %arg13[%c0_57, %c0_58, %c0_59] : memref<1x32x64xbf16, #tpu.memory_space<vmem>>, vector<1x32x64xbf16>
    %113 = vector.shape_cast %112 : vector<1x32x64xbf16> to vector<32x64xbf16>
    %cst_60 = arith.constant dense<0.000000e+00> : vector<16x64xf32>
    %114 = tpu.matmul %111, %113, %cst_60 {dimension_numbers = #tpu.dot_dimension_numbers<[1], [0], [0], [1], [0, 0, 1, 1], [], []>} : vector<16x32xbf16>, vector<32x64xbf16>, vector<16x64xf32> -> vector<16x64xf32>
    %c0_61 = arith.constant 0 : index
    %c0_62 = arith.constant 0 : index
    %c0_63 = arith.constant 0 : index
    %115 = vector.load %arg14[%c0_61, %c0_62, %c0_63] : memref<1x1x64xf32, #tpu.memory_space<vmem>>, vector<1x1x64xf32>
    %116 = vector.shape_cast %115 : vector<1x1x64xf32> to vector<1x64xf32>
    %117 = vector.broadcast %116 : vector<1x64xf32> to vector<16x64xf32>
    %118 = arith.addf %114, %117 : vector<16x64xf32>
    %cst_64 = arith.constant 5.000000e-01 : f32
    %119 = vector.broadcast %cst_64 : f32 to vector<16x64xf32>
    %120 = arith.mulf %119, %118 : vector<16x64xf32>
    %cst_65 = arith.constant 4.471500e-02 : f32
    %121 = vector.broadcast %cst_65 : f32 to vector<16x64xf32>
    %122 = arith.mulf %121, %118 : vector<16x64xf32>
    %123 = arith.mulf %122, %118 : vector<16x64xf32>
    %124 = arith.mulf %123, %118 : vector<16x64xf32>
    %125 = arith.addf %118, %124 : vector<16x64xf32>
    %cst_66 = arith.constant 0.797884583 : f32
    %126 = vector.broadcast %cst_66 : f32 to vector<16x64xf32>
    %127 = arith.mulf %126, %125 : vector<16x64xf32>
    %128 = math.tanh %127 : vector<16x64xf32>
    %cst_67 = arith.constant 1.000000e+00 : f32
    %129 = vector.broadcast %cst_67 : f32 to vector<16x64xf32>
    %130 = arith.addf %129, %128 : vector<16x64xf32>
    %131 = arith.mulf %120, %130 : vector<16x64xf32>
    %132 = arith.truncf %131 : vector<16x64xf32> to vector<16x64xbf16>
    %c0_68 = arith.constant 0 : index
    %c0_69 = arith.constant 0 : index
    %c0_70 = arith.constant 0 : index
    %133 = vector.load %arg15[%c0_68, %c0_69, %c0_70] : memref<1x64x32xbf16, #tpu.memory_space<vmem>>, vector<1x64x32xbf16>
    %134 = vector.shape_cast %133 : vector<1x64x32xbf16> to vector<64x32xbf16>
    %cst_71 = arith.constant dense<0.000000e+00> : vector<16x32xf32>
    %135 = tpu.matmul %132, %134, %cst_71 {dimension_numbers = #tpu.dot_dimension_numbers<[1], [0], [0], [1], [0, 0, 1, 1], [], []>} : vector<16x64xbf16>, vector<64x32xbf16>, vector<16x32xf32> -> vector<16x32xf32>
    %c0_72 = arith.constant 0 : index
    %c0_73 = arith.constant 0 : index
    %c0_74 = arith.constant 0 : index
    %136 = vector.load %arg16[%c0_72, %c0_73, %c0_74] : memref<1x1x32xf32, #tpu.memory_space<vmem>>, vector<1x1x32xf32>
    %137 = vector.shape_cast %136 : vector<1x1x32xf32> to vector<1x32xf32>
    %138 = vector.broadcast %137 : vector<1x32xf32> to vector<16x32xf32>
    %139 = arith.addf %135, %138 : vector<16x32xf32>
    %140 = arith.addf %139, %110 : vector<16x32xf32>
    %c0_75 = arith.constant 0 : index
    %c0_76 = arith.constant 0 : index
    %c0_77 = arith.constant 0 : index
    %141 = vector.load %arg17[%c0_75, %c0_76, %c0_77] : memref<1x1x32xf32, #tpu.memory_space<vmem>>, vector<1x1x32xf32>
    %142 = vector.shape_cast %141 : vector<1x1x32xf32> to vector<1x32xf32>
    %c0_78 = arith.constant 0 : index
    %c0_79 = arith.constant 0 : index
    %c0_80 = arith.constant 0 : index
    %143 = vector.load %arg18[%c0_78, %c0_79, %c0_80] : memref<1x1x32xf32, #tpu.memory_space<vmem>>, vector<1x1x32xf32>
    %144 = vector.shape_cast %143 : vector<1x1x32xf32> to vector<1x32xf32>
    %cst_81 = arith.constant dense<0.000000e+00> : vector<16xf32>
    %145 = vector.multi_reduction <add>, %140, %cst_81 [1] : vector<16x32xf32> to vector<16xf32>
    %146 = vector.shape_cast %145 : vector<16xf32> to vector<16x1xf32>
    %cst_82 = arith.constant 3.200000e+01 : f32
    %147 = vector.broadcast %cst_82 : f32 to vector<16x1xf32>
    %148 = arith.divf %146, %147 : vector<16x1xf32>
    %149 = vector.broadcast %148 : vector<16x1xf32> to vector<16x32xf32>
    %150 = arith.subf %140, %149 : vector<16x32xf32>
    %151 = arith.mulf %150, %150 : vector<16x32xf32>
    %cst_83 = arith.constant dense<0.000000e+00> : vector<16xf32>
    %152 = vector.multi_reduction <add>, %151, %cst_83 [1] : vector<16x32xf32> to vector<16xf32>
    %153 = vector.shape_cast %152 : vector<16xf32> to vector<16x1xf32>
    %cst_84 = arith.constant 3.200000e+01 : f32
    %154 = vector.broadcast %cst_84 : f32 to vector<16x1xf32>
    %155 = arith.divf %153, %154 : vector<16x1xf32>
    %156 = vector.broadcast %148 : vector<16x1xf32> to vector<16x32xf32>
    %157 = arith.subf %140, %156 : vector<16x32xf32>
    %cst_85 = arith.constant 9.99999996E-13 : f32
    %158 = vector.broadcast %cst_85 : f32 to vector<16x1xf32>
    %159 = arith.addf %155, %158 : vector<16x1xf32>
    %160 = math.rsqrt %159 : vector<16x1xf32>
    %161 = vector.broadcast %160 : vector<16x1xf32> to vector<16x32xf32>
    %162 = arith.mulf %157, %161 : vector<16x32xf32>
    %163 = vector.broadcast %142 : vector<1x32xf32> to vector<16x32xf32>
    %164 = arith.mulf %162, %163 : vector<16x32xf32>
    %165 = vector.broadcast %144 : vector<1x32xf32> to vector<16x32xf32>
    %166 = arith.addf %164, %165 : vector<16x32xf32>
    %c0_86 = arith.constant 0 : index
    %c0_87 = arith.constant 0 : index
    %167 = vector.load %arg19[%c0_86, %c0_87] : memref<16x32xf32, #tpu.memory_space<vmem>>, vector<16x32xf32>
    tpu.vector_store %arg19[%c0_86, %c0_87], %166 {strides = array<i32>} : memref<16x32xf32, #tpu.memory_space<vmem>>, vector<16x32xf32>,
    return
  }
  func.func @transform_0(%arg0: i32) -> (i32, i32) {
    %c0_i32 = arith.constant 0 : i32
    %c0_i32_0 = arith.constant 0 : i32
    %c0_i32_1 = arith.constant 0 : i32
    return %c0_i32, %c0_i32_0 : i32, i32
  }
  func.func @transform_1(%arg0: i32) -> (i32, i32) {
    %c0_i32 = arith.constant 0 : i32
    %c0_i32_0 = arith.constant 0 : i32
    %c0_i32_1 = arith.constant 0 : i32
    return %c0_i32, %c0_i32_0 : i32, i32
  }
  func.func @transform_2(%arg0: i32) -> (i32, i32, i32) {
    %c0_i32 = arith.constant 0 : i32
    %c0_i32_0 = arith.constant 0 : i32
    %c0_i32_1 = arith.constant 0 : i32
    return %arg0, %c0_i32, %c0_i32_0 : i32, i32, i32
  }
  func.func @transform_3(%arg0: i32) -> (i32, i32, i32) {
    %c0_i32 = arith.constant 0 : i32
    %c0_i32_0 = arith.constant 0 : i32
    %c0_i32_1 = arith.constant 0 : i32
    return %arg0, %c0_i32, %c0_i32_0 : i32, i32, i32
  }
  func.func @transform_4(%arg0: i32) -> (i32, i32, i32) {
    %c0_i32 = arith.constant 0 : i32
    %c0_i32_0 = arith.constant 0 : i32
    %c0_i32_1 = arith.constant 0 : i32
    return %arg0, %c0_i32, %c0_i32_0 : i32, i32, i32
  }
  func.func @transform_5(%arg0: i32) -> (i32, i32, i32) {
    %c0_i32 = arith.constant 0 : i32
    %c0_i32_0 = arith.constant 0 : i32
    %c0_i32_1 = arith.constant 0 : i32
    return %arg0, %c0_i32, %c0_i32_0 : i32, i32, i32
  }
  func.func @transform_6(%arg0: i32) -> (i32, i32, i32) {
    %c0_i32 = arith.constant 0 : i32
    %c0_i32_0 = arith.constant 0 : i32
    %c0_i32_1 = arith.constant 0 : i32
    return %arg0, %c0_i32, %c0_i32_0 : i32, i32, i32
  }
  func.func @transform_7(%arg0: i32) -> (i32, i32, i32) {
    %c0_i32 = arith.constant 0 : i32
    %c0_i32_0 = arith.constant 0 : i32
    %c0_i32_1 = arith.constant 0 : i32
    return %arg0, %c0_i32, %c0_i32_0 : i32, i32, i32
  }
  func.func @transform_8(%arg0: i32) -> (i32, i32, i32) {
    %c0_i32 = arith.constant 0 : i32
    %c0_i32_0 = arith.constant 0 : i32
    %c0_i32_1 = arith.constant 0 : i32
    return %arg0, %c0_i32, %c0_i32_0 : i32, i32, i32
  }
  func.func @transform_9(%arg0: i32) -> (i32, i32, i32) {
    %c0_i32 = arith.constant 0 : i32
    %c0_i32_0 = arith.constant 0 : i32
    %c0_i32_1 = arith.constant 0 : i32
    return %arg0, %c0_i32, %c0_i32_0 : i32, i32, i32
  }
  func.func @transform_10(%arg0: i32) -> (i32, i32, i32) {
    %c0_i32 = arith.constant 0 : i32
    %c0_i32_0 = arith.constant 0 : i32
    %c0_i32_1 = arith.constant 0 : i32
    return %arg0, %c0_i32, %c0_i32_0 : i32, i32, i32
  }
  func.func @transform_11(%arg0: i32) -> (i32, i32, i32) {
    %c0_i32 = arith.constant 0 : i32
    %c0_i32_0 = arith.constant 0 : i32
    %c0_i32_1 = arith.constant 0 : i32
    return %arg0, %c0_i32, %c0_i32_0 : i32, i32, i32
  }
  func.func @transform_12(%arg0: i32) -> (i32, i32, i32) {
    %c0_i32 = arith.constant 0 : i32
    %c0_i32_0 = arith.constant 0 : i32
    %c0_i32_1 = arith.constant 0 : i32
    return %arg0, %c0_i32, %c0_i32_0 : i32, i32, i32
  }
  func.func @transform_13(%arg0: i32) -> (i32, i32, i32) {
    %c0_i32 = arith.constant 0 : i32
    %c0_i32_0 = arith.constant 0 : i32
    %c0_i32_1 = arith.constant 0 : i32
    return %arg0, %c0_i32, %c0_i32_0 : i32, i32, i32
  }
  func.func @transform_14(%arg0: i32) -> (i32, i32, i32) {
    %c0_i32 = arith.constant 0 : i32
    %c0_i32_0 = arith.constant 0 : i32
    %c0_i32_1 = arith.constant 0 : i32
    return %arg0, %c0_i32, %c0_i32_0 : i32, i32, i32
  }
  func.func @transform_15(%arg0: i32) -> (i32, i32, i32) {
    %c0_i32 = arith.constant 0 : i32
    %c0_i32_0 = arith.constant 0 : i32
    %c0_i32_1 = arith.constant 0 : i32
    return %arg0, %c0_i32, %c0_i32_0 : i32, i32, i32
  }
  func.func @transform_16(%arg0: i32) -> (i32, i32, i32) {
    %c0_i32 = arith.constant 0 : i32
    %c0_i32_0 = arith.constant 0 : i32
    %c0_i32_1 = arith.constant 0 : i32
    return %arg0, %c0_i32, %c0_i32_0 : i32, i32, i32
  }
  func.func @transform_17(%arg0: i32) -> (i32, i32, i32) {
    %c0_i32 = arith.constant 0 : i32
    %c0_i32_0 = arith.constant 0 : i32
    %c0_i32_1 = arith.constant 0 : i32
    return %arg0, %c0_i32, %c0_i32_0 : i32, i32, i32
  }
  func.func @transform_18(%arg0: i32) -> (i32, i32) {
    %c0_i32 = arith.constant 0 : i32
    %c0_i32_0 = arith.constant 0 : i32
    %c0_i32_1 = arith.constant 0 : i32
    return %c0_i32, %c0_i32_0 : i32, i32
  }
}

</mosaic_0001>

<bundles_post_ra>
// kernel: tpu_custom_call.1
= control target key start
LH: loop header
LB: loop body
LE: loop exit
PB: predicated region body
PF: predicated region fallthrough
CT: control target
= control target key end

     0   :  { %s2762_s0 = inlined_call_operand.hbm [shape: f32[16,32], index: 0, kind: input, shape index: {}]   ;;  %s2763_s1 = inlined_call_operand.hbm [shape: f32[16,16], index: 1, kind: input, shape index: {}]   ;;  %s2764_s2 = inlined_call_operand.vmem [shape: bf16[2,32,32], index: 2, kind: input, shape index: {}]   ;;  %s2765_s3 = inlined_call_operand.vmem [shape: bf16[2,32,32], index: 3, kind: input, shape index: {}]   ;;  %s2766_s4 = inlined_call_operand.vmem [shape: bf16[2,32,32], index: 4, kind: input, shape index: {}]   ;;  %s2767_s5 = inlined_call_operand.vmem [shape: f32[2,1,32], index: 5, kind: input, shape index: {}]   ;;  %s2768_s6 = inlined_call_operand.vmem [shape: f32[2,1,32], index: 6, kind: input, shape index: {}]   ;;  %s2769_s7 = inlined_call_operand.hbm [shape: f32[2,1,32], index: 7, kind: input, shape index: {}]   ;;  %s2770_s8 = inlined_call_operand.hbm [shape: bf16[2,32,32], index: 8, kind: input, shape index: {}]   ;;  %s2771_s9 = inlined_call_operand.vmem [shape: f32[2,1,32], index: 9, kind: input, shape index: {}]   ;;  %s2772_s10 = inlined_call_operand.vmem [shape: f32[2,1,32], index: 10, kind: input, shape index: {}]   ;;  %s2773_s11 = inlined_call_operand.hbm [shape: f32[2,1,32], index: 11, kind: input, shape index: {}]   ;;  %s2774_s12 = inlined_call_operand.hbm [shape: bf16[2,32,64], index: 12, kind: input, shape index: {}]   ;;  %s2775_s13 = inlined_call_operand.vmem [shape: f32[2,1,64], index: 13, kind: input, shape index: {}]   ;;  %s2776_s14 = inlined_call_operand.vmem [shape: bf16[2,64,32], index: 14, kind: input, shape index: {}]   ;;  %s2777_s15 = inlined_call_operand.vmem [shape: f32[2,1,32], index: 15, kind: input, shape index: {}]   ;;  %s2778_s16 = inlined_call_operand.vmem [shape: f32[2,1,32], index: 16, kind: input, shape index: {}]   ;;  %s2779_s17 = inlined_call_operand.hbm [shape: f32[2,1,32], index: 17, kind: input, shape index: {}]   ;;  %s2780_s18 = inlined_call_operand.hbm [shape: f32[16,32], index: 18, kind: output, shape index: {}]  }
   0x1   :  { %2789 = sst [smem:[#allocation21_spill]] %s2762_s0 }
   0x2   :  { %2790 = sst [smem:[#allocation22_spill]] %s2763_s1 }
   0x3   :  { %2791 = sst [smem:[#allocation23_spill]] %s2764_s2 }
   0x4   :  { %2792 = sst [smem:[#allocation24_spill]] %s2765_s3 }
   0x5   :  { %2793 = sst [smem:[#allocation25_spill]] %s2766_s4 }
   0x6   :  { %2794 = sst [smem:[#allocation26_spill]] %s2768_s6 }
   0x7   :  { %2795 = sst [smem:[#allocation27_spill]] %s2769_s7 }
   0x8   :  { %2796 = sst [smem:[#allocation28_spill]] %s2770_s8 }
   0x9   :  { %2797 = sst [smem:[#allocation29_spill]] %s2771_s9 }
   0xa   :  { %2798 = sst [smem:[#allocation30_spill]] %s2772_s10 }
   0xb   :  { %2799 = sst [smem:[#allocation31_spill]] %s2773_s11 }
   0xc   :  { %2800 = sst [smem:[#allocation32_spill]] %s2774_s12 }
   0xd   :  { %2801 = sst [smem:[#allocation33_spill]] %s2775_s13 }
   0xe   :  { %2802 = sst [smem:[#allocation34_spill]] %s2776_s14 }
   0xf   :  { %2803 = sst [smem:[#allocation35_spill]] %s2777_s15 }
  0x10   :  { %2804 = sst [smem:[#allocation36_spill]] %s2778_s16 }
  0x11   :  { %2805 = sst [smem:[#allocation37_spill]] %s2780_s18 }
  0x12   :  { %23 = vsyncpa [#allocation4], 0 }
  0x13   :  { %24 = vsyncpa [#allocation7], 0 }
  0x14   :  { %25 = vsyncpa [#allocation5], 0  ;;  %s2383_s27 = smov 0   ;;  %s2385_s28 = smov 0  }
  0x15   :  { %s2387_s29 = smov 0   ;;  %s2389_s30 = smov 0  }
  0x16 LB: > { %2806 = sst [smem:[#allocation18_spill]] %s2270_s29  ;;  %s2402_s0 = sadd.s32 4294967295, %s2274_s30   ;;  %s2274_s30 = sphi %s2389_s30, %s2848_s30   ;;  %s2270_s29 = sphi %s2387_s29, %s2850_s29   ;;  %s2266_s28 = sphi %s2385_s28, %s2852_s28   ;;  %s2262_s27 = sphi %s2383_s27, %s2851_s27  }
  0x17   : > { %p223_p0 = scmp.ne.s32.totalorder %s2266_s28, %s2262_s27  ;;  %p224_p1 = scmp.eq.s32.totalorder %s2402_s0, 0 }
  0x18   : > { %p1740_p2 = scmp.ge.s32.totalorder %s2274_s30, 1  ;;  %p515_p3 = scmp.lt.s32.totalorder %s2274_s30, 3 }
  0x19   : > { %p1741_p4 = scmp.ne.s32.totalorder %s2402_s0, 0  ;;  %p2411_p5 = por %p224_p1, %p223_p0 }
  0x1a   : > { %s2808_s21 = sld [smem:[#allocation21_spill]]  ;;  %p2418_p6 = pnand %p1740_p2, %p515_p3 }
  0x1b   : > { %s2276_s23 = smov [#allocation3]   ;;  %s2431_s26 = sadd.s32 1, %s2274_s30  }
  0x1c   : > { %p1876_p7 = pneg %p2418_p6  ;;  %s528_s24 = sshll.u32 %s2276_s23, 4  ;;  %s529_s24 = int_to_ptr.vmem [resolvable:$true] %s528_s24 }
  0x1d   : > { %2811 = sst [smem:[#allocation19_spill]] %s2431_s26  ;;  %s2781_s27 = smov 128  }
  0x1e   : > { %p2426_p8 = pnand %p1876_p7, %p224_p1  ;;  %s2782_s1 = smov 8  }
  0x1f   : > { %s207_s20 = ssub.s32 %s2274_s30, %s2431_s26  ;;  %p217_p10 = scmp.ne.s32.totalorder %s2270_s29, %s2266_s28 }
  0x20   : > { %s526_s22 = sshll.u32 %s2808_s21, 4  ;;  %s210_s21 = sadd.s32 1, %s2270_s29  ;;  %s527_s22 = int_to_ptr.hbm [resolvable:$true] %s526_s22 }
  0x21   : > { %1879 = dma.hbm_to_vmem [thread:$0]  (!%p2426_p8), %s527_s22, 256, %s529_s24, [#allocation4], %s2781_s27, %s2781_s27, %s2782_s1  }
  0x22   : > { %p208_p9 = scmp.eq.s32.totalorder %s207_s20, 0  ;;  %p218_p11 = scmp.eq.s32.totalorder %s2274_s30, 0 }
  0x23   : > { %p1901_p12 = scmp.lt.s32.totalorder %s2274_s30, 2  ;;  %s592_s18 = sand.u32 1, %s2274_s30  }
  0x24   : > { %s2446_s23 = scalar_select %p208_p9, %s2270_s29, %s210_s21  }
  0x25   : > { %p219_p13 = por %p218_p11, %p217_p10  ;;  %s2450_s16 = sand.u32 1, %s2270_s29  }
  0x26   : > { %2812 = sst [smem:[#allocation20_spill]] %s2446_s23  ;;  %s595_s27 = scalar_lea.vmem [#allocation8], %s2450_s16 }
  0x27   : > { %s2813_s7 = sld [smem:[#allocation27_spill]]  ;;  %s602_s20 = sshll.u32 %s595_s27, 4  ;;  %s603_s20 = int_to_ptr.vmem [resolvable:$true] %s602_s20 }
  0x28   : > { %p2457_p0 = pnand %p1901_p12, %p219_p13  ;;  %s2786_s23 = sshll.u32 %s2274_s30, 4 }
  0x29   : > { %s2815_s8 = sld [smem:[#allocation28_spill]]  ;;  %s2468_s15 = scalar_lea.sflag [#allocation4], %s592_s18 }
  0x2a   : > { %p2472_p3 = pneg %p2457_p0 }
  0x2d   : > { %s598_s22 = scalar_lea.hbm %s2813_s7, %s2274_s30  ;;  %s2027_s29 = scalar_lea.hbm %s2813_s7, 2 }
  0x2e   : > { %s600_s24 = sshll.u32 %s598_s22, 4  ;;  %s601_s24 = int_to_ptr.hbm [resolvable:$true] %s600_s24 }
  0x2f   : > { %s618_s14 = scalar_lea.hbm %s2815_s8, %s2786_s23  ;;  %s2020_s13 = sshra.s32 %s601_s24, 4  ;;  %s2021_s13 = int_to_ptr.hbm [resolvable:$true] %s2020_s13 }
  0x30   : > { %s2022_s22 = scalar_lea.hbm %s2021_s13, 1  ;;  %p2028_p10 = scmp.lt.s32.totalorder %s2021_s13, %s2813_s7 }
  0x31   : > { %p2023_p2 = scmp.ne.s32.totalorder %s2021_s13, %s2022_s22  ;;  %p2029_p11 = scmp.lt.s32.totalorder %s2027_s29, %s2022_s22 }
  0x33   : > { %p2025_p7 = pnand %p2472_p3, %p2023_p2  ;;  %p2030_p12 = por %p2029_p11, %p2028_p10 }
  0x35   : > { %p2026_p9 = pneg %p2025_p7 }
  0x37   : > { %p2031_p13 = pnand %p2030_p12, %p2026_p9 }
  0x39   : > { %2034 = shalt.err (!%p2031_p13)
}
  0x3a   : > { %1886 = dma.hbm_to_vmem [thread:$0]  (!%p2457_p0), %s601_s24, 16, %s603_s20, %s2468_s15  }
  0x3b   : > { %s619_s23 = sshll.u32 %s618_s14, 4  ;;  %s2817_s9 = sshll.u32 %s2450_s16, 4  ;;  %s620_s23 = int_to_ptr.hbm [resolvable:$true] %s619_s23 }
  0x3c   : > { %s613_s6 = scalar_lea.vmem [#allocation9], %s2817_s9  ;;  %s2050_s10 = sshra.s32 %s620_s23, 4  ;;  %s2051_s10 = int_to_ptr.hbm [resolvable:$true] %s2050_s10 }
  0x3d   : > { %s621_s4 = sshll.u32 %s613_s6, 4  ;;  %s2052_s21 = scalar_lea.hbm %s2051_s10, 16  ;;  %s622_s4 = int_to_ptr.vmem [resolvable:$true] %s621_s4 }
  0x3e   : > { %p2053_p2 = scmp.ne.s32.totalorder %s2051_s10, %s2052_s21  ;;  %s2057_s29 = scalar_lea.hbm %s2815_s8, 32 }
  0x3f   : > { %p2058_p10 = scmp.lt.s32.totalorder %s2051_s10, %s2815_s8  ;;  %p2059_p11 = scmp.lt.s32.totalorder %s2057_s29, %s2052_s21 }
  0x40   : > { %p2055_p7 = pnand %p2053_p2, %p2472_p3 }
  0x41   : > { %p2060_p12 = por %p2059_p11, %p2058_p10 }
  0x42   : > { %p2056_p9 = pneg %p2055_p7 }
  0x44   : > { %p2061_p13 = pnand %p2060_p12, %p2056_p9 }
  0x46   : > { %2064 = shalt.err (!%p2061_p13)
}
  0x47   : > { %s2787_s6 = smov 64   ;;  %s2788_s9 = smov 4  }
  0x48   : > { %1889 = dma.hbm_to_vmem [thread:$0]  (!%p2457_p0), %s620_s23, 256, %s622_s4, %s2468_s15, %s2787_s6, %s2787_s6, %s2788_s9  }
  0x49   : > { %s2818_s11 = sld [smem:[#allocation31_spill]]  ;;  %s646_s21 = scalar_lea.vmem [#allocation10], %s2450_s16 }
  0x4a   : > { %s653_s13 = sshll.u32 %s646_s21, 4  ;;  %s654_s13 = int_to_ptr.vmem [resolvable:$true] %s653_s13 }
  0x4f   : > { %s649_s14 = scalar_lea.hbm %s2818_s11, %s2274_s30  ;;  %s2087_s4 = scalar_lea.hbm %s2818_s11, 2 }
  0x50   : > { %s651_s10 = sshll.u32 %s649_s14, 4  ;;  %s652_s10 = int_to_ptr.hbm [resolvable:$true] %s651_s10 }
  0x51   : > { %s2080_s22 = sshra.s32 %s652_s10, 4  ;;  %s2081_s22 = int_to_ptr.hbm [resolvable:$true] %s2080_s22 }
  0x52   : > { %s2082_s29 = scalar_lea.hbm %s2081_s22, 1  ;;  %p2088_p10 = scmp.lt.s32.totalorder %s2081_s22, %s2818_s11 }
  0x53   : > { %p2083_p2 = scmp.ne.s32.totalorder %s2081_s22, %s2082_s29  ;;  %p2089_p11 = scmp.lt.s32.totalorder %s2087_s4, %s2082_s29 }
  0x55   : > { %p2085_p7 = pnand %p2083_p2, %p2472_p3  ;;  %p2090_p12 = por %p2089_p11, %p2088_p10 }
  0x57   : > { %p2086_p9 = pneg %p2085_p7 }
  0x59   : > { %p2091_p13 = pnand %p2090_p12, %p2086_p9 }
  0x5b   : > { %2094 = shalt.err (!%p2091_p13)
}
  0x5c   : > { %1892 = dma.hbm_to_vmem [thread:$0]  (!%p2457_p0), %s652_s10, 16, %s654_s13, %s2468_s15  }
  0x5d   : > { %s2819_s24 = sshll.u32 %s2274_s30, 4  ;;  %s2820_s12 = sld [smem:[#allocation32_spill]] }
  0x5e   : > { %s2821_s18 = sshll.u32 %s2450_s16, 4 }
  0x5f   : > { %s664_s6 = scalar_lea.vmem [#allocation11], %s2821_s18 }
  0x60   : > { %s672_s22 = sshll.u32 %s664_s6, 4  ;;  %s673_s22 = int_to_ptr.vmem [resolvable:$true] %s672_s22 }
  0x63   : > { %s669_s21 = scalar_lea.hbm %s2820_s12, %s2819_s24  ;;  %s2117_s13 = scalar_lea.hbm %s2820_s12, 32 }
  0x64   : > { %s670_s26 = sshll.u32 %s669_s21, 4  ;;  %s671_s26 = int_to_ptr.hbm [resolvable:$true] %s670_s26 }
  0x65   : > { %s2110_s29 = sshra.s32 %s671_s26, 4  ;;  %s2111_s29 = int_to_ptr.hbm [resolvable:$true] %s2110_s29 }
  0x66   : > { %s2112_s4 = scalar_lea.hbm %s2111_s29, 16  ;;  %p2118_p10 = scmp.lt.s32.totalorder %s2111_s29, %s2820_s12 }
  0x67   : > { %p2113_p2 = scmp.ne.s32.totalorder %s2111_s29, %s2112_s4  ;;  %p2119_p11 = scmp.lt.s32.totalorder %s2117_s13, %s2112_s4 }
  0x69   : > { %p2115_p7 = pnand %p2113_p2, %p2472_p3  ;;  %p2120_p12 = por %p2119_p11, %p2118_p10 }
  0x6b   : > { %p2116_p9 = pneg %p2115_p7 }
  0x6d   : > { %p2121_p13 = pnand %p2120_p12, %p2116_p9 }
  0x6f   : > { %2124 = shalt.err (!%p2121_p13)
}
  0x70   : > { %s2822_s24 = smov 4   ;;  %s2823_s14 = smov 64  }
  0x71   : > { %1895 = dma.hbm_to_vmem [thread:$0]  (!%p2457_p0), %s671_s26, 256, %s673_s22, %s2468_s15, %s2823_s14, %s2823_s14, %s2822_s24  }
  0x72   : > { %s2824_s6 = sld [smem:[#allocation22_spill]]  ;;  %s2281_s9 = smov [#allocation6]  }
  0x73   : > { %s542_s29 = sshll.u32 %s2281_s9, 4  ;;  %s2825_s4 = smov 8   ;;  %s543_s29 = int_to_ptr.vmem [resolvable:$true] %s542_s29 }
  0x74   : > { %s2826_s10 = smov 128   ;;  %s714_s7 = scalar_lea.hbm %s2779_s17, %s2274_s30 }
  0x75   : > { %s711_s8 = scalar_lea.vmem [#allocation12], %s2450_s16  ;;  %s716_s22 = sshll.u32 %s714_s7, 4  ;;  %s717_s22 = int_to_ptr.hbm [resolvable:$true] %s716_s22 }
  0x76   : > { %s718_s26 = sshll.u32 %s711_s8, 4  ;;  %s2170_s24 = sshra.s32 %s717_s22, 4  ;;  %s719_s26 = int_to_ptr.vmem [resolvable:$true] %s718_s26  ;;  %s2171_s24 = int_to_ptr.hbm [resolvable:$true] %s2170_s24 }
  0x77   : > { %s2172_s14 = scalar_lea.hbm %s2171_s24, 1  ;;  %s2177_s18 = scalar_lea.hbm %s2779_s17, 2 }
  0x78   : > { %s540_s23 = sshll.u32 %s2824_s6, 4  ;;  %p2173_p2 = scmp.ne.s32.totalorder %s2171_s24, %s2172_s14  ;;  %s541_s23 = int_to_ptr.hbm [resolvable:$true] %s540_s23 }
  0x79   : > { %1882 = dma.hbm_to_vmem [thread:$0]  (!%p2426_p8), %s541_s23, 256, %s543_s29, [#allocation7], %s2826_s10, %s2826_s10, %s2825_s4  }
  0x7a   : > { %p2175_p7 = pnand %p2173_p2, %p2472_p3  ;;  %p2178_p8 = scmp.lt.s32.totalorder %s2171_s24, %s2779_s17 }
  0x7b   : > { %p2179_p10 = scmp.lt.s32.totalorder %s2177_s18, %s2172_s14 }
  0x7c   : > { %p2176_p9 = pneg %p2175_p7 }
  0x7d   : > { %p2180_p11 = por %p2179_p10, %p2178_p8 }
  0x7f   : > { %p2181_p12 = pnand %p2180_p11, %p2176_p9 }
  0x81   : > { %2184 = shalt.err (!%p2181_p12)
}
  0x82   : > { %1898 = dma.hbm_to_vmem [thread:$0]  (!%p2457_p0), %s717_s22, 16, %s719_s26, %s2468_s15  }
  0x83   : > { %727 = sbr.rel (%p2418_p6) target bundleno = 2066 (0x812), region = 92 }
  0x88   : > { %2245 = dma.done.wait (%p224_p1), [#allocation4], 256  }
  0x89   : > { %2247 = vsyncadd (%p224_p1), [#allocation4], 4294967040 }
  0x8a   : > { %2249 = dma.done.wait (%p224_p1), [#allocation7], 256  }
  0x8b   : > { %2251 = vsyncadd (%p224_p1), [#allocation7], 4294967040  ;;  %s739_s7 = sand.u32 1, %s2402_s0   ;;  %s2576_s8 = sand.u32 1, %s2266_s28  }
  0x8c   : > { %s740_s16 = scalar_lea.sflag [#allocation4], %s739_s7 }
  0x8d   : > { %2253 = dma.done.wait (%p2411_p5), %s740_s16, 560  }
  0x8e   : > { %2255 = vsyncadd (%p2411_p5), %s740_s16, 4294966736  ;;  %s1753_s2 = sshll.u32 %s2576_s8, 4  ;;  %p887_p6 = scmp.lt.s32.totalorder %s2402_s0, 1 }
  0x8f   : > { %s2827_s10 = sld [smem:[#allocation23_spill]]  ;;  %s2634_s9 = scalar_lea.vmem [#allocation9], %s1753_s2 }
  0x90   : > { %s2586_s1 = scalar_select %p887_p6, %s2402_s0, 1 }
  0x91   : > { %s2828_s3 = sld [smem:[#allocation24_spill]]  ;;  %s761_s29 = scalar_lea.vmem [#allocation10], %s2576_s8 }
  0x92   : > { %s1836_s15 = sshll.u32 %s2586_s1, 4  ;;  %s2829_s25 = sld [smem:[#allocation25_spill]] }
  0x93   : > { %s2832_s4 = sld [smem:[#allocation30_spill]]  ;;  %s1839_s12 = sshll.u32 %s2586_s1, 5 }
  0x94   : > { %s2833_s26 = sld [smem:[#allocation33_spill]]  ;;  %s780_s11 = scalar_lea.vmem [#allocation12], %s2576_s8 }
  0x95   : > { %s891_s13 = scalar_lea.vmem %s2827_s10, %s1836_s15  ;;  %s2834_s14 = sld [smem:[#allocation34_spill]] }
  0x96   : > { %s2835_s23 = sld [smem:[#allocation35_spill]] }
  0x97   : > { %s896_s22 = scalar_lea.vmem %s2828_s3, %s1836_s15  ;;  %s2836_s27 = sld [smem:[#allocation36_spill]] }
  0x98   : > { %s2602_s21 = scalar_lea.vmem %s2829_s25, %s1836_s15 }
  0x99   : > { %s913_s10 = scalar_lea.vmem %s2832_s4, %s2586_s1  ;;  %s2637_s4 = scalar_lea.vmem [#allocation11], %s1753_s2 }
  0x9a   : > { %s916_s3 = scalar_lea.vmem %s2833_s26, %s2586_s1  ;;  %932 = sbr.rel (%p1741_p4) target bundleno = 162 (0xa2), region = 124 }
  0x9b   : > { %s2624_s25 = scalar_lea.vmem %s2834_s14, %s1839_s12 }
  0x9c   : > { %s924_s7 = scalar_lea.vmem %s2835_s23, %s2586_s1 }
  0x9d   : > { %s927_s30 = scalar_lea.vmem %s2836_s27, %s2586_s1 }
  0x9f   : > { %v933_v0 = vld [vmem:[#allocation3] sm:$0xff]  ;;  %vm935_vm0 = vcmask 261120   ;;  %v934_v1 = vld [vmem:[#allocation3 + $0x8] sm:$0xff] }
  0xa0   : > { %936 = vst.msk [vmem:[#allocation13] sm:$0xff] %vm935_vm0, %v933_v0 }
  0xa1   : > { %937 = vst.msk [vmem:[#allocation13 + $0x8] sm:$0xff] %vm935_vm0, %v934_v1 }
  0xa2 PF: > { %v1843_v2 = vld [vmem:[%s896_s22 + $0x8] sm:$0xff]  ;;  %v1842_v3 = vld [vmem:[%s896_s22] sm:$0xff]  ;;  %vm963_vm1 = vcmask 261120   ;;  %s2837_s22 = sld [smem:[#allocation26_spill]]  ;;  %vm1052_vm2 = vcmask 130048   ;;  %s2839_s24 = scalar_lea.vmem %s2767_s5, %s2586_s1  ;;  %vm1201_vm3 = vcmask 261248  }
  0xa3   : > { %v1841_v6 = vld [vmem:[%s891_s13 + $0x8] sm:$0xff]  ;;  %1007 = vmatpush.bf16.msra.mxu1 %v1843_v2  ;;  %v1840_v7 = vld [vmem:[%s891_s13] sm:$0xff]  ;;  %s2282_s15 = smov 112   ;;  %s2283_s14 = smov 16   ;;  %vm1402_vm11 = vcmask 523264  }
  0xa4   : > { %973 = vmatpush.bf16.msra.mxu0 %v1841_v6  ;;  %v1951_v15 = vld [vmem:[%s2839_s24] ss:$0 sm:$0xff]  ;;  %v942_v31 = vld [vmem:[#allocation6 + $0x8] sm:$0xff]  ;;  %s2841_s23 = sld [smem:[#allocation29_spill]]  ;;  %p1904_p1 = scmp.eq.s32.totalorder %s2402_s0, 1 }
  0xa5   : > { %v941_v26 = vld [vmem:[#allocation6] sm:$0xff]  ;;  %v1845_v35 = vld [vmem:[%s2602_s21 + $0x8] sm:$0xff]  ;;  %s2286_s26 = smov 128   ;;  %s2287_s24 = smov 8  }
  0xa6   : > { %1041 = vmatpush.bf16.msra.mxu2 %v1845_v35  ;;  %v1844_v36 = vld [vmem:[%s2602_s21] sm:$0xff]  ;;  %s2840_s21 = scalar_lea.vmem [#allocation8], %s2576_s8  ;;  %s2847_s8 = sld [smem:[#allocation37_spill]] }
  0xa7   : > { %v2642_v4 = vld [vmem:[#allocation13] sm:$0xff]  ;;  %1008 = vmatpush.bf16.msra.mxu1 %v1842_v3  ;;  %v1952_v49 = vld [vmem:[%s2840_s21] ss:$0 sm:$0xff] }
  0xa8   : > { %v2644_v5 = vld [vmem:[#allocation13 + $0x8] sm:$0xff]  ;;  %974 = vmatpush.bf16.msra.mxu0 %v1840_v7  ;;  %s2838_s20 = scalar_lea.vmem %s2837_s22, %s2586_s1 }
  0xa9   : > { %v940_v8 = vpack.c.bf16 %v2644_v5, %v2642_v4  ;;  %v1950_v11 = vld [vmem:[%s2838_s20] ss:$0 sm:$0xff] }
  0xaa   : > { %1042 = vmatpush.bf16.msra.mxu2 %v1844_v36  ;;  %s2842_s16 = scalar_lea.vmem %s2841_s23, %s2586_s1 }
  0xab   : > { %1781 = vmatmul.msk.bf16.vlgmr.msra.gmra.mxu1 %vm963_vm1, %v940_v8  ;;  %1772 = vmatmul.msk.bf16.vlgmr.msra.gmra.mxu0 %vm963_vm1, %v940_v8  ;;  %v1953_v35 = vld [vmem:[%s2842_s16] ss:$0 sm:$0xff] }
  0xad   : > { %1790 = vmatmul.msk.bf16.vlgmr.msra.gmra.mxu2 %vm963_vm1, %v940_v8 }
 0x128   : > { %v1010_v9 = vpop.f32.mrf.mxu1  ;;  %v976_v10 = vpop.f32.mrf.mxu0 }
 0x129   : > { %v1011_v13 = vadd.f32 %v1950_v11, %v1010_v9  ;;  %v977_v19 = vadd.f32 %v1951_v15, %v976_v10 }
 0x130   : > { %v1012_v12 = vpop.f32.mrf.mxu1  ;;  %v978_v17 = vpop.f32.mrf.mxu0 }
 0x131   : > { %v1013_v14 = vadd.f32 %v1950_v11, %v1012_v12  ;;  %v979_v20 = vadd.f32 %v1951_v15, %v978_v17  ;;  %v1044_v46 = vpop.f32.mrf.mxu2 }
 0x132   : > { %v1045_v51 = vadd.f32 %v1952_v49, %v1044_v46 }
 0x133   : > { %v1050_v16 = vpack.c.bf16 %v1013_v14, %v1011_v13  ;;  %v1049_v21 = vpack.c.bf16 %v979_v20, %v977_v19 }
 0x135   : > { %1123 = vrot.lane.b32.xlu0 %v1050_v16, %s2282_s15  ;;  %v1057_v18 = vsel %vm1052_vm2, %v1050_v16, 0 }
 0x136   : > { %1066 = vmatpush.bf16.xpose.msra.mxu3 %v1057_v18 }
 0x139   : > { %v1046_v53 = vpop.f32.mrf.mxu2 }
 0x13a   : > { %v1047_v55 = vadd.f32 %v1952_v49, %v1046_v53 }
 0x13c   : > { %v1051_v59 = vpack.c.bf16 %v1047_v55, %v1045_v51 }
 0x13d   : > { %1120 = vrot.lane.b32.xlu0 %v1049_v21, %s2282_s15  ;;  %1791 = vmatmul.msk.bf16.vlgmr.msra.gmra.mxu3 %vm1052_vm2, %v1049_v21 }
 0x13e   : > { %1110 = vmatpush.bf16.msrb.mxu0 %v1051_v59 }
 0x1a7   : > { %v1124_v22 = vpop.permute.xlu0 %1123 }
 0x1a8   : > { %v1129_v23 = vsel %vm1052_vm2, %v1124_v22, 0 }
 0x1a9   : > { %1138 = vmatpush.bf16.xpose.msrb.mxu1 %v1129_v23 }
 0x1af   : > { %v1121_v24 = vpop.permute.xlu0 %1120 }
 0x1b0   : > { %1793 = vmatmul.msk.bf16.vlgmr.msrb.gmra.mxu1 %vm1052_vm2, %v1121_v24 }
 0x1c0   : > { %v1068_v25 = vpop.f32.mrf.mxu3 }
 0x1c1   : > { %v1073_v27 = vmul.f32 0.25, %v1068_v25 }
 0x1c3   : > { %v1075_v28 = vadd.f32 %v1073_v27, %v941_v26 }
 0x1c5   : > { %v1077_v29 = vsel %vm1052_vm2, %v1075_v28, -inf }
 0x1c6   : > { %1078 = vmax.xlane.f32.xlu2 %v1077_v29  ;;  %v1846_v29 = vld [vmem:[%s2634_s9] sm:$0xff] }
 0x1c8   : > { %v1070_v30 = vpop.f32.mrf.mxu3 }
 0x1c9   : > { %v1074_v32 = vmul.f32 0.25, %v1070_v30 }
 0x1cb   : > { %v1076_v33 = vadd.f32 %v1074_v32, %v942_v31 }
 0x1cd   : > { %v1080_v34 = vsel %vm1052_vm2, %v1076_v33, -inf }
 0x1ce   : > { %1081 = vmax.xlane.f32.xlu2 %v1080_v34 }
 0x1e6   : > { %1173 = vrot.lane.b32.xlu2 %v1051_v59, %s2282_s15  ;;  %v1849_v59 = vld [vmem:[%s2637_s4 + $0x8] sm:$0xff] }
 0x1e7   : > { %1339 = vmatpush.bf16.msra.mxu0 %v1849_v59 }
 0x22d   : > { %v1140_v37 = vpop.f32.mrf.mxu1 }
 0x22e   : > { %v1145_v38 = vmul.f32 0.25, %v1140_v37 }
 0x230   : > { %v1147_v39 = vadd.f32 %v1145_v38, %v941_v26 }
 0x232   : > { %v1149_v40 = vsel %vm1052_vm2, %v1147_v39, -inf }
 0x233   : > { %1150 = vmax.xlane.f32.xlu1 %v1149_v40 }
 0x235   : > { %v1142_v41 = vpop.f32.mrf.mxu1 }
 0x236   : > { %v1146_v42 = vmul.f32 0.25, %v1142_v41 }
 0x238   : > { %v1148_v43 = vadd.f32 %v1146_v42, %v942_v31 }
 0x239   : > { %v1079_v50 = vpop.xlane.xlu2 %1078 }
 0x23a   : > { %v1152_v44 = vsel %vm1052_vm2, %v1148_v43, -inf  ;;  %v1083_v57 = vsub.f32 %v1075_v28, %v1079_v50  ;;  %v1847_v28 = vld [vmem:[%s2634_s9 + $0x8] sm:$0xff] }
 0x23b   : > { %1153 = vmax.xlane.f32.xlu1 %v1152_v44  ;;  %1236 = vmatpush.bf16.msrb.mxu3 %v1847_v28  ;;  %v2284_v44 = vmov 32.0   ;;  %v1853_v28 = vld [vmem:[%s2624_s25 + $0x18] sm:$0xff] }
 0x23c   : > { %v1085_v61 = vmul.f32 1.442695, %v1083_v57  ;;  %1410 = vmatpush.bf16.msra.mxu1 %v1853_v28  ;;  %v1959_v28 = vld [vmem:[%s780_s11] ss:$0 sm:$0xff]  ;;  %s1487_s11 = sshll.u32 %s2847_s8, 4  ;;  %s1488_s11 = int_to_ptr.hbm [resolvable:$true] %s1487_s11 }
 0x23f   : > { %1237 = vmatpush.bf16.msrb.mxu3 %v1846_v29  ;;  %v1852_v29 = vld [vmem:[%s2624_s25 + $0x10] sm:$0xff] }
 0x240   : > { %1411 = vmatpush.bf16.msra.mxu1 %v1852_v29 }
 0x241   : > { %v1082_v62 = vpop.xlane.xlu2 %1081 }
 0x242   : > { %v1084_v0 = vsub.f32 %v1076_v33, %v1082_v62 }
 0x244   : > { %v1087_v2 = vmul.f32 1.442695, %v1084_v0 }
 0x249   : > { %v1174_v9 = vpop.permute.xlu2 %1173 }
 0x24a   : > { %1186 = vmatpush.bf16.msrb.mxu2 %v1174_v9 }
 0x2a6   : > { %v1151_v45 = vpop.xlane.xlu1 %1150 }
 0x2a7   : > { %v1155_v47 = vsub.f32 %v1147_v39, %v1151_v45 }
 0x2a9   : > { %v1157_v48 = vmul.f32 1.442695, %v1155_v47 }
 0x2ab   : > { %1960 = vpow2.f32 %v1157_v48 }
 0x2ae   : > { %v1154_v52 = vpop.xlane.xlu1 %1153 }
 0x2af   : > { %v1156_v54 = vsub.f32 %v1148_v43, %v1154_v52 }
 0x2b1   : > { %v1961_v56 = vpop.eup %1960  ;;  %v1159_v58 = vmul.f32 1.442695, %v1156_v54 }
 0x2b2   : > { %v1161_v60 = vsel %vm1052_vm2, %v1961_v56, 0.0 }
 0x2b3   : > { %1962 = vpow2.f32 %v1159_v58  ;;  %1162 = vadd.xlane.f32.xlu0 %v1161_v60 }
 0x2b4   : > { %1964 = vpow2.f32 %v1085_v61 }
 0x2b5   : > { %1966 = vpow2.f32 %v1087_v2 }
 0x2b9   : > { %v1963_v63 = vpop.eup %1962 }
 0x2ba   : > { %v1164_v1 = vsel %vm1052_vm2, %v1963_v63, 0.0  ;;  %v1965_v3 = vpop.eup %1964 }
 0x2bb   : > { %1165 = vadd.xlane.f32.xlu1 %v1164_v1  ;;  %v1089_v6 = vsel %vm1052_vm2, %v1965_v3, 0.0  ;;  %v1967_v7 = vpop.eup %1966 }
 0x2bc   : > { %v1092_v8 = vsel %vm1052_vm2, %v1967_v7, 0.0 }
 0x2c3   : > { %1090 = vadd.xlane.f32.xlu1 %v1089_v6 }
 0x2cb   : > { %1093 = vadd.xlane.f32.xlu1 %v1092_v8 }
 0x326   : > { %v1163_v10 = vpop.xlane.xlu0 %1162 }
 0x327   : > { %1968 = vrcp.f32 %v1163_v10 }
 0x32d   : > { %v1969_v12 = vpop.eup %1968 }
 0x32e   : > { %v1166_v11 = vpop.xlane.xlu1 %1165  ;;  %v1169_v14 = vmul.f32 %v1969_v12, %v1961_v56 }
 0x32f   : > { %1970 = vrcp.f32 %v1166_v11 }
 0x335   : > { %v1971_v13 = vpop.eup %1970 }
 0x336   : > { %v1170_v15 = vmul.f32 %v1971_v13, %v1963_v63  ;;  %v1091_v16 = vpop.xlane.xlu1 %1090  ;;  %v1848_v63 = vld [vmem:[%s2637_s4] sm:$0xff] }
 0x337   : > { %1972 = vrcp.f32 %v1091_v16  ;;  %1340 = vmatpush.bf16.msra.mxu0 %v1848_v63 }
 0x338   : > { %v1171_v17 = vpack.c.bf16 %v1170_v15, %v1169_v14 }
 0x33a   : > { %1794 = vmatmul.msk.bf16.vlgmr.msrb.gmra.mxu2 %vm1052_vm2, %v1171_v17  ;;  %v1954_v17 = vld [vmem:[%s913_s10] ss:$0 sm:$0xff] }
 0x33d   : > { %v1973_v19 = vpop.eup %1972 }
 0x33e   : > { %v1094_v18 = vpop.xlane.xlu1 %1093  ;;  %v1097_v21 = vmul.f32 %v1973_v19, %v1965_v3 }
 0x33f   : > { %1974 = vrcp.f32 %v1094_v18 }
 0x340   : > { %1976 = vrcp.f32 %v2284_v44 }
 0x345   : > { %v1975_v20 = vpop.eup %1974 }
 0x346   : > { %v1098_v22 = vmul.f32 %v1975_v20, %v1967_v7  ;;  %v1977_v45 = vpop.eup %1976 }
 0x347   : > { %v1255_v46 = vmul.f32 32.0, %v1977_v45  ;;  %vm1259_vm4 = vweird.f32 %v1977_v45 }
 0x348   : > { %v1099_v23 = vpack.c.bf16 %v1098_v22, %v1097_v21  ;;  %v1955_v21 = vld [vmem:[%s761_s29] ss:$0 sm:$0xff] }
 0x349   : > { %v1256_v47 = vsub.f32 1.0, %v1255_v46 }
 0x34a   : > { %1792 = vmatmul.msk.bf16.vlgmr.msrb.gmra.mxu0 %vm1052_vm2, %v1099_v23 }
 0x34b   : > { %v1257_v48 = vmul.f32 %v1977_v45, %v1256_v47 }
 0x34d   : > { %v1258_v49 = vadd.f32 %v1977_v45, %v1257_v48 }
 0x3bd   : > { %v1188_v24 = vpop.f32.mrf.mxu2 }
 0x3be   : > { %1195 = vrot.lane.b32.xlu1 %v1188_v24, %s2283_s14 }
 0x3c5   : > { %v1190_v25 = vpop.f32.mrf.mxu2 }
 0x3c6   : > { %1197 = vrot.lane.b32.xlu2 %v1190_v25, %s2283_s14 }
 0x3c7   : > { %v1112_v26 = vpop.f32.mrf.mxu0 }
 0x3c8   : > { %1117 = vst.msk [vmem:[#allocation2] sm:$0xff] %vm1052_vm2, %v1112_v26 }
 0x3cf   : > { %v1114_v27 = vpop.f32.mrf.mxu0 }
 0x3d0   : > { %1118 = vst.msk [vmem:[#allocation2 + $0x8] sm:$0xff] %vm1052_vm2, %v1114_v27 }
 0x420   : > { %v1198_v30 = vpop.permute.xlu2 %1197 }
 0x421   : > { %1203 = vst.msk [vmem:[#allocation2 + $0x8] sm:$0xff] %vm1201_vm3, %v1198_v30  ;;  %v1851_v30 = vld [vmem:[%s2624_s25 + $0x8] sm:$0xff] }
 0x422   : > { %1412 = vmatpush.bf16.msra.mxu1 %v1851_v30 }
 0x428   : > { %v1205_v33 = vld [vmem:[#allocation2 + $0x8] sm:$0xff] }
 0x430   : > { %v1196_v31 = vpop.permute.xlu1 %1195 }
 0x431   : > { %1202 = vst.msk [vmem:[#allocation2] sm:$0xff] %vm1201_vm3, %v1196_v31  ;;  %v1850_v31 = vld [vmem:[%s2624_s25] sm:$0xff] }
 0x432   : > { %1413 = vmatpush.bf16.msra.mxu1 %v1850_v31 }
 0x438   : > { %v1204_v32 = vld [vmem:[#allocation2] sm:$0xff] }
 0x439   : > { %v1206_v34 = vpack.c.bf16 %v1205_v33, %v1204_v32  ;;  %v1956_v32 = vld [vmem:[%s916_s3] ss:$0 sm:$0xff] }
 0x43b   : > { %1803 = vmatmul.msk.bf16.vlgmr.msrb.gmra.mxu3 %vm963_vm1, %v1206_v34 }
 0x4be   : > { %v1239_v36 = vpop.f32.mrf.mxu3 }
 0x4bf   : > { %v1240_v37 = vadd.f32 %v1953_v35, %v1239_v36 }
 0x4c1   : > { %v1244_v38 = vadd.f32 %v1240_v37, %v2642_v4  ;;  %v2696_v4 = vsel %vm1259_vm4, %v1977_v45, %v1258_v49 }
 0x4c3   : > { %v1248_v39 = vsel %vm963_vm1, %v1244_v38, 0.0 }
 0x4c4   : > { %1249 = vadd.xlane.f32.xlu2 %v1248_v39 }
 0x4c6   : > { %v1241_v40 = vpop.f32.mrf.mxu3 }
 0x4c7   : > { %v1242_v41 = vadd.f32 %v1953_v35, %v1241_v40 }
 0x4c9   : > { %v1245_v42 = vadd.f32 %v1242_v41, %v2644_v5 }
 0x4cb   : > { %v1251_v43 = vsel %vm963_vm1, %v1245_v42, 0.0 }
 0x4cc   : > { %1252 = vadd.xlane.f32.xlu0 %v1251_v43 }
 0x537   : > { %v1250_v50 = vpop.xlane.xlu2 %1249 }
 0x538   : > { %v1261_v51 = vmul.f32 %v2696_v4, %v1250_v50 }
 0x53a   : > { %v1263_v52 = vsub.f32 %v1244_v38, %v1261_v51 }
 0x53c   : > { %v1265_v5 = vmul.f32 %v1263_v52, %v1263_v52 }
 0x53e   : > { %v1267_v53 = vsel %vm963_vm1, %v1265_v5, 0.0 }
 0x53f   : > { %v1253_v54 = vpop.xlane.xlu0 %1252  ;;  %1268 = vadd.xlane.f32.xlu1 %v1267_v53 }
 0x540   : > { %v1262_v55 = vmul.f32 %v2696_v4, %v1253_v54 }
 0x542   : > { %v1264_v56 = vsub.f32 %v1245_v42, %v1262_v55  ;;  %v1957_v55 = vld [vmem:[%s924_s7] ss:$0 sm:$0xff] }
 0x544   : > { %v1266_v57 = vmul.f32 %v1264_v56, %v1264_v56 }
 0x546   : > { %v1270_v58 = vsel %vm963_vm1, %v1266_v57, 0.0 }
 0x547   : > { %1271 = vadd.xlane.f32.xlu0 %v1270_v58 }
 0x5b2   : > { %v1269_v60 = vpop.xlane.xlu1 %1268 }
 0x5b3   : > { %v1273_v61 = vmul.f32 %v1269_v60, %v2696_v4 }
 0x5b5   : > { %v1275_v62 = vadd.f32 1e-12, %v1273_v61 }
 0x5b7   : > { %1978 = vrsqrt.f32 %v1275_v62  ;;  %vm1283_vm6 = vweird.f32 %v1275_v62 }
 0x5ba   : > { %v1272_v0 = vpop.xlane.xlu0 %1271 }
 0x5bb   : > { %v1274_v1 = vmul.f32 %v1272_v0, %v2696_v4 }
 0x5bd   : > { %v1979_v2 = vpop.eup %1978  ;;  %v1276_v3 = vadd.f32 1e-12, %v1274_v1 }
 0x5be   : > { %v1278_v6 = vmul.f32 %v1979_v2, %v1275_v62  ;;  %vm1284_vm5 = vweird.f32 %v1979_v2 }
 0x5bf   : > { %1980 = vrsqrt.f32 %v1276_v3  ;;  %vm1285_vm7 = vmor %vm1283_vm6, %vm1284_vm5  ;;  %vm1293_vm9 = vweird.f32 %v1276_v3 }
 0x5c0   : > { %v1279_v7 = vmul.f32 %v1979_v2, %v1278_v6 }
 0x5c2   : > { %v1280_v8 = vmul.f32 0.5, %v1279_v7 }
 0x5c4   : > { %v1281_v9 = vsub.f32 1.5, %v1280_v8 }
 0x5c5   : > { %v1981_v10 = vpop.eup %1980 }
 0x5c6   : > { %v1282_v11 = vmul.f32 %v1979_v2, %v1281_v9  ;;  %v1288_v12 = vmul.f32 %v1981_v10, %v1276_v3  ;;  %vm1294_vm8 = vweird.f32 %v1981_v10 }
 0x5c7   : > { %vm1295_vm10 = vmor %vm1293_vm9, %vm1294_vm8 }
 0x5c8   : > { %v1289_v13 = vmul.f32 %v1981_v10, %v1288_v12  ;;  %v1286_v14 = vsel %vm1285_vm7, %v1979_v2, %v1282_v11 }
 0x5c9   : > { %v1297_v18 = vmul.f32 %v1286_v14, %v1263_v52 }
 0x5ca   : > { %v1290_v15 = vmul.f32 0.5, %v1289_v13 }
 0x5cb   : > { %v1302_v22 = vmul.f32 %v1954_v17, %v1297_v18 }
 0x5cc   : > { %v1291_v16 = vsub.f32 1.5, %v1290_v15 }
 0x5cd   : > { %v1307_v25 = vadd.f32 %v1955_v21, %v1302_v22 }
 0x5ce   : > { %v1292_v19 = vmul.f32 %v1981_v10, %v1291_v16 }
 0x5d0   : > { %v1296_v20 = vsel %vm1295_vm10, %v1981_v10, %v1292_v19 }
 0x5d1   : > { %v1298_v23 = vmul.f32 %v1296_v20, %v1264_v56 }
 0x5d3   : > { %v1303_v24 = vmul.f32 %v1954_v17, %v1298_v23 }
 0x5d5   : > { %v1308_v26 = vadd.f32 %v1955_v21, %v1303_v24 }
 0x5d7   : > { %v1309_v27 = vpack.c.bf16 %v1308_v26, %v1307_v25 }
 0x5d9   : > { %1812 = vmatmul.msk.bf16.vlgmr.msra.gmra.mxu0 %vm963_vm1, %v1309_v27 }
 0x656   : > { %v1342_v33 = vpop.f32.mrf.mxu0 }
 0x657   : > { %v1343_v34 = vadd.f32 %v1956_v32, %v1342_v33 }
 0x659   : > { %v1349_v35 = vmul.f32 0.044715, %v1343_v34  ;;  %v1347_v50 = vmul.f32 0.5, %v1343_v34 }
 0x65b   : > { %v1351_v36 = vmul.f32 %v1349_v35, %v1343_v34 }
 0x65d   : > { %v1353_v37 = vmul.f32 %v1351_v36, %v1343_v34 }
 0x65e   : > { %v1344_v38 = vpop.f32.mrf.mxu0 }
 0x65f   : > { %v1355_v39 = vadd.f32 %v1353_v37, %v1343_v34  ;;  %v1345_v40 = vadd.f32 %v1956_v32, %v1344_v38 }
 0x661   : > { %v1350_v41 = vmul.f32 0.044715, %v1345_v40  ;;  %v1357_v42 = vmul.f32 0.7978846, %v1355_v39  ;;  %v1348_v51 = vmul.f32 0.5, %v1345_v40 }
 0x663   : > { %v1352_v43 = vmul.f32 %v1350_v41, %v1345_v40  ;;  %1982 = vtanh.f32 %v1357_v42 }
 0x665   : > { %v1354_v44 = vmul.f32 %v1352_v43, %v1345_v40 }
 0x667   : > { %v1356_v45 = vadd.f32 %v1354_v44, %v1345_v40 }
 0x669   : > { %v1358_v46 = vmul.f32 0.7978846, %v1356_v45  ;;  %v1983_v47 = vpop.eup %1982 }
 0x66a   : > { %v1361_v48 = vadd.f32 1.0, %v1983_v47 }
 0x66b   : > { %1984 = vtanh.f32 %v1358_v46 }
 0x66c   : > { %v1363_v5 = vmul.f32 %v1361_v48, %v1347_v50 }
 0x671   : > { %v1985_v49 = vpop.eup %1984 }
 0x672   : > { %v1362_v52 = vadd.f32 1.0, %v1985_v49 }
 0x674   : > { %v1364_v53 = vmul.f32 %v1362_v52, %v1348_v51 }
 0x676   : > { %v1365_v54 = vpack.c.bf16 %v1364_v53, %v1363_v5 }
 0x678   : > { %1829 = vmatmul.msk.bf16.vlgmr.msra.gmra.mxu1 %vm1402_vm11, %v1365_v54 }
 0x6f5   : > { %v1415_v56 = vpop.f32.mrf.mxu1 }
 0x6f6   : > { %v1416_v57 = vadd.f32 %v1957_v55, %v1415_v56 }
 0x6f8   : > { %v1420_v58 = vadd.f32 %v1416_v57, %v1307_v25 }
 0x6fa   : > { %v1424_v59 = vsel %vm963_vm1, %v1420_v58, 0.0 }
 0x6fb   : > { %1425 = vadd.xlane.f32.xlu0 %v1424_v59 }
 0x6fd   : > { %v1417_v60 = vpop.f32.mrf.mxu1 }
 0x6fe   : > { %v1418_v61 = vadd.f32 %v1957_v55, %v1417_v60 }
 0x700   : > { %v1421_v62 = vadd.f32 %v1418_v61, %v1308_v26  ;;  %v1958_v26 = vld [vmem:[%s927_s30] ss:$0 sm:$0xff]  ;;  %s2285_s30 = smov [#allocation13]  }
 0x701   : > { %s1485_s1 = sshll.u32 %s2285_s30, 4  ;;  %s1486_s1 = int_to_ptr.vmem [resolvable:$true] %s1485_s1 }
 0x702   : > { %v1427_v63 = vsel %vm963_vm1, %v1421_v62, 0.0 }
 0x703   : > { %1428 = vadd.xlane.f32.xlu0 %v1427_v63 }
 0x76e   : > { %v1426_v0 = vpop.xlane.xlu0 %1425 }
 0x76f   : > { %v1430_v1 = vmul.f32 %v1426_v0, %v2696_v4 }
 0x771   : > { %v1432_v2 = vsub.f32 %v1420_v58, %v1430_v1 }
 0x773   : > { %v1434_v3 = vmul.f32 %v1432_v2, %v1432_v2 }
 0x775   : > { %v1436_v6 = vsel %vm963_vm1, %v1434_v3, 0.0 }
 0x776   : > { %1437 = vadd.xlane.f32.xlu2 %v1436_v6  ;;  %v1429_v7 = vpop.xlane.xlu0 %1428 }
 0x777   : > { %v1431_v8 = vmul.f32 %v1429_v7, %v2696_v4 }
 0x779   : > { %v1433_v9 = vsub.f32 %v1421_v62, %v1431_v8 }
 0x77b   : > { %v1435_v10 = vmul.f32 %v1433_v9, %v1433_v9 }
 0x77d   : > { %v1439_v11 = vsel %vm963_vm1, %v1435_v10, 0.0 }
 0x77e   : > { %1440 = vadd.xlane.f32.xlu0 %v1439_v11 }
 0x7e9   : > { %v1438_v12 = vpop.xlane.xlu2 %1437 }
 0x7ea   : > { %v1442_v13 = vmul.f32 %v1438_v12, %v2696_v4 }
 0x7ec   : > { %v1444_v14 = vadd.f32 1e-12, %v1442_v13 }
 0x7ee   : > { %1986 = vrsqrt.f32 %v1444_v14  ;;  %vm1452_vm13 = vweird.f32 %v1444_v14 }
 0x7f1   : > { %v1441_v15 = vpop.xlane.xlu0 %1440 }
 0x7f2   : > { %v1443_v16 = vmul.f32 %v1441_v15, %v2696_v4 }
 0x7f4   : > { %v1987_v17 = vpop.eup %1986  ;;  %v1445_v18 = vadd.f32 1e-12, %v1443_v16 }
 0x7f5   : > { %v1447_v19 = vmul.f32 %v1987_v17, %v1444_v14  ;;  %vm1453_vm12 = vweird.f32 %v1987_v17 }
 0x7f6   : > { %1988 = vrsqrt.f32 %v1445_v18  ;;  %vm1454_vm14 = vmor %vm1452_vm13, %vm1453_vm12  ;;  %vm1462_vm0 = vweird.f32 %v1445_v18 }
 0x7f7   : > { %v1448_v20 = vmul.f32 %v1987_v17, %v1447_v19 }
 0x7f9   : > { %v1449_v21 = vmul.f32 0.5, %v1448_v20 }
 0x7fb   : > { %v1450_v22 = vsub.f32 1.5, %v1449_v21 }
 0x7fc   : > { %v1989_v23 = vpop.eup %1988 }
 0x7fd   : > { %v1451_v24 = vmul.f32 %v1987_v17, %v1450_v22  ;;  %v1457_v25 = vmul.f32 %v1989_v23, %v1445_v18  ;;  %vm1463_vm15 = vweird.f32 %v1989_v23 }
 0x7fe   : > { %vm1464_vm2 = vmor %vm1462_vm0, %vm1463_vm15 }
 0x7ff   : > { %v1455_v4 = vsel %vm1454_vm14, %v1987_v17, %v1451_v24  ;;  %v1458_v27 = vmul.f32 %v1989_v23, %v1457_v25 }
 0x800   : > { %v1466_v29 = vmul.f32 %v1455_v4, %v1432_v2 }
 0x801   : > { %v1459_v30 = vmul.f32 0.5, %v1458_v27 }
 0x802   : > { %v1471_v31 = vmul.f32 %v1958_v26, %v1466_v29 }
 0x803   : > { %v1460_v32 = vsub.f32 1.5, %v1459_v30 }
 0x804   : > { %v1476_v33 = vadd.f32 %v1959_v28, %v1471_v31 }
 0x805   : > { %v1461_v34 = vmul.f32 %v1989_v23, %v1460_v32 }
 0x806   : > { %1478 = vst.msk [vmem:[#allocation13] sm:$0xff] %vm963_vm1, %v1476_v33 }
 0x807   : > { %v1465_v35 = vsel %vm1464_vm2, %v1989_v23, %v1461_v34 }
 0x808   : > { %v1467_v36 = vmul.f32 %v1465_v35, %v1433_v9 }
 0x80a   : > { %v1472_v37 = vmul.f32 %v1958_v26, %v1467_v36 }
 0x80c   : > { %v1477_v38 = vadd.f32 %v1959_v28, %v1472_v37 }
 0x80e   : > { %1479 = vst.msk [vmem:[#allocation13 + $0x8] sm:$0xff] %vm963_vm1, %v1477_v38 }
 0x80f   : > { %1873 = dma.vmem_to_hbm [thread:$0]  (%p1904_p1), %s1486_s1, 256, %s1488_s11, [#allocation5], %s2286_s26, %s2286_s26, %s2287_s24  }
 0x810   : > { %2257 = dma.done.wait (%p1904_p1), [#allocation5], 256  }
 0x811   : > { %2259 = vsyncadd (%p1904_p1), [#allocation5], 4294967040 }
 0x812 PF: > { %s2848_s30 = sld [smem:[#allocation19_spill]]  ;;  %s2851_s27 = smov %s2266_s28 }
 0x813   : > { %s2849_s15 = sld [smem:[#allocation18_spill]] }
 0x814   : > { %s2850_s29 = sld [smem:[#allocation20_spill]] }
 0x818   : > { %p28_p4 = scmp.ge.s32.totalorder %s2848_s30, 4  }
 0x819   : > { %s2852_s28 = smov %s2849_s15 }
 0x81a   :  { %30 = sbr.rel (!%p28_p4) target bundleno = 22 (0x16), region = 217 }
 0x81f   :  { %1504 = vsyncpa [#allocation4], 1 }
 0x820   :  { %1506 = vsyncpa [#allocation4 + $0x1], 1 }
 0x821   :  { %1507 = vsyncpa [#allocation7], 1 }
 0x822   :  { %1508 = vsyncpa [#allocation5], 1 }
 0x823   :  { %1510 = vsyncpa [#allocation5 + $0x1], 1 }

</bundles_post_ra>
